<compile_context>
chip_gen: v7x
topology: tpu7x:2x2x1
jax: 0.10.0
libtpu: 0.0.40
codegen_flags: <defaults>
</compile_context>

<pallas_src>
import functools

import jax
import jax.numpy as jnp
from jax import lax
from jax.experimental import pallas as pl
from jax.experimental.pallas import tpu as pltpu


# -----------------------------------------------------------------------------
# Kernel
# -----------------------------------------------------------------------------
def _ensemble_mha_kernel(q_ref, k_ref, v_ref, mask_ref,
                         wq_ref, wk_ref, wv_ref, wo_ref,
                         gamma_ref, beta_ref, out_ref,
                         *, n_head, d_k, d_v, mm_dtype):
    del d_k  # implied by the pre-split weight shapes
    BB, Eq, TQ, D = q_ref.shape
    _, Ek, Lk, _ = k_ref.shape
    H = n_head
    f32 = jnp.float32
    neg = f32(-1e9)

    if mm_dtype is None:
        mm = lambda x: x
    else:
        mm = lambda x: x.astype(mm_dtype)

    q = q_ref[...]          # (BB, Eq, TQ, D)
    k = k_ref[...]          # (BB, Ek, Lk, D)
    v = v_ref[...]          # (BB, Ek, Lk, D)
    wq = wq_ref[...]        # (Eq, H, D, d_k)   (pre-scaled by 1/sqrt(d_k))
    wk = wk_ref[...]        # (Ek, H, D, d_k)
    wv = wv_ref[...]        # (Ek, H, D, d_v)
    wo = wo_ref[...]        # (Eq, H, d_v, D)
    gamma = gamma_ref[...]  # (1, D)
    beta = beta_ref[...]    # (1, D)

    # int8 mask, 1 = keep.  Computed once per grid step.
    keep = mask_ref[...] != 0                                  # (BB, TQ, Lk) bool

    # --- K / V projections per (k-ensemble, head) -----------------------------
    # Heads come straight out of their own matmuls (weights pre-split in the
    # wrapper), so there are no lane slices / relayouts of activations here.
    # Activations are cast to the matmul dtype once per k-ensemble.
    k_h = []   # k_h[j][h]: (BB, Lk, d_k)
    v_h = []   # v_h[j][h]: (BB, Lk, d_v)
    for j in range(Ek):
        kj = mm(k[:, j].reshape(BB * Lk, D))                   # leading-axis select
        vj = mm(v[:, j].reshape(BB * Lk, D))
        k_h.append([mm(jnp.dot(kj, wk[j, h], preferred_element_type=f32)
                       ).reshape(BB, Lk, wk.shape[-1]) for h in range(H)])
        v_h.append([mm(jnp.dot(vj, wv[j, h], preferred_element_type=f32)
                       ).reshape(BB, Lk, d_v) for h in range(H)])

    # --- per q-ensemble attention --------------------------------------------
    for i in range(Eq):
        q_i = q[:, i]                                          # (BB, TQ, D)
        q_flat = mm(q_i.reshape(BB * TQ, D))                   # cast hoisted per i

        acc = None                                             # fc output, (BB*TQ, D) f32
        for h in range(H):
            qh = mm(jnp.dot(q_flat, wq[i, h],
                            preferred_element_type=f32)).reshape(BB, TQ, wq.shape[-1])

            # Scores vs every k-ensemble (no concatenation of the key axis).
            # Exact masked_fill(-1e9) semantics, so fully-masked query rows
            # reproduce the reference (uniform softmax) bit-for-bit in spirit.
            s = []
            for j in range(Ek):
                s_jh = jnp.einsum('bqd,bkd->bqk', qh, k_h[j][h],
                                  preferred_element_type=f32)  # (BB, TQ, Lk)
                s.append(jnp.where(keep, s_jh, neg))

            # Joint softmax over the (k-ensemble, key) axes, kept in f32.
            m = s[0].max(axis=-1, keepdims=True)
            for s_j in s[1:]:
                m = jnp.maximum(m, s_j.max(axis=-1, keepdims=True))
            p = [jnp.exp(s_j - m) for s_j in s]
            den = p[0].sum(axis=-1, keepdims=True)
            for p_j in p[1:]:
                den = den + p_j.sum(axis=-1, keepdims=True)
            if mm_dtype is None:
                inv = 1.0 / den                                # exact (f32 parity path)
            else:
                inv = pl.reciprocal(den, approx=True)          # EUP, off the VALU path

            # Weighted sum over values (attn_dropout: eval mode -> identity).
            o_h = None
            for j in range(Ek):
                pv = jnp.einsum('bqk,bkd->bqd', mm(p[j] * inv), v_h[j][h],
                                preferred_element_type=f32)    # (BB, TQ, d_v)
                o_h = pv if o_h is None else o_h + pv

            # Head recombination folded into the fc matmul (accumulate over h)
            # -> no head_outs concatenation.
            part = jnp.dot(mm(o_h.reshape(BB * TQ, d_v)), wo[i, h],
                           preferred_element_type=f32)         # (BB*TQ, D)
            acc = part if acc is None else acc + part

        # dropout: eval mode -> identity; residual is the un-projected q.
        out_i = acc + q_i.reshape(BB * TQ, D)

        # LayerNorm over d_model (eps=1e-6, biased variance); rsqrt on the EUP.
        mu = jnp.mean(out_i, axis=-1, keepdims=True)
        ctr = out_i - mu
        var = jnp.mean(ctr * ctr, axis=-1, keepdims=True)
        out_i = ctr * lax.rsqrt(var + 1e-6) * gamma + beta

        # Direct store of this ensemble's slab (no output concatenation).
        out_ref[:, :, i * D:(i + 1) * D] = out_i.reshape(BB, TQ, D)


# -----------------------------------------------------------------------------
# Block-size / VMEM heuristics
# -----------------------------------------------------------------------------
def _device_kind():
    try:
        return jax.devices()[0].device_kind.lower()
    except Exception:
        return ""


def _divisors_desc(n):
    return [d for d in range(n, 0, -1) if n % d == 0]


def _vmem_estimate(bb, bq, *, Lk, Eq, Ek, H, d_k, d_v, D, mm_bytes, w_buffers):
    """Rough per-grid-step VMEM footprint (bytes)."""
    f32 = 4
    lanes = lambda n: -(-n // 128) * 128                 # lane padding of narrow tiles
    # pipelined operands (double-buffered)
    io = 2 * bb * (Eq * bq + 2 * Ek * Lk) * D * f32      # q, k, v blocks
    io += 2 * bb * bq * lanes(Lk)                        # int8 mask
    io += 2 * bb * bq * Eq * D * f32                     # output block
    # constant-index weights (single- or double-buffered)
    w = (Eq * H * D * lanes(d_k) + Ek * H * D * (lanes(d_k) + lanes(d_v))
         + Eq * H * max(8, d_v) * D + 2 * D) * mm_bytes
    io += w_buffers * w
    # live intermediates: per-(j,h) K/V projections, scores/probs for one (i,h),
    # per-head output + fc accumulator (2x head-room factor).
    inter = bb * Ek * H * Lk * (lanes(d_k) + lanes(d_v)) * mm_bytes
    inter += 3 * bb * bq * lanes(Lk) * Ek * f32
    inter += bb * bq * (lanes(d_v) + 2 * D) * f32
    return int(io + 2 * inter)


def _pick_blocks(B, Lq, est_fn, *, is_v7x, block_b=None, block_q=None):
    """Largest (block_b, block_q) whose working set fits the VMEM budget.

    v7x: 64 MiB VMEM budget and prefer >= 2 grid steps so both TensorCores get
    work; v5e/v6e: larger tiles (>=512-1024 rows to approach the HBM roofline).
    """
    rows_cap = 1024 if is_v7x else 2048
    budget = (56 if is_v7x else 100) * (1 << 20)

    bq_cands = [block_q] if block_q is not None else (
        [d for d in _divisors_desc(Lq) if d == Lq or d % 8 == 0] or [Lq])
    bb_cands = [block_b] if block_b is not None else _divisors_desc(B)

    def pick(require_two_steps):
        best = None
        for bq in bq_cands:
            for bb in bb_cands:
                if bb * bq > rows_cap:
                    continue
                if require_two_steps and (B // bb) * (Lq // bq) < 2:
                    continue
                if est_fn(bb, bq) > budget:
                    continue
                if best is None or bb * bq > best[0] * best[1]:
                    best = (bb, bq)
        return best

    best = pick(True) if (is_v7x and block_b is None and block_q is None) else None
    if best is None:
        best = pick(False)
    if best is None:
        best = (bb_cands[-1], bq_cands[-1])
    return best


# -----------------------------------------------------------------------------
# Wrapper
# -----------------------------------------------------------------------------
def ensemble_mha(q, k, v, mask, wq, wk, wv, wo, gamma, beta, *,
                 n_head, d_k, d_v, block_b=None, block_q=None,
                 use_bf16_matmul=True, single_buffer_weights=None):
    """q/k/v: (B, L, E, d_model) like the PyTorch module; weights pre-transposed
    to (E, d_in, d_out); mask: (B, Lq, Lk), nonzero = keep."""
    B, Lq, Eq, D = q.shape
    _, Lk, Ek, _ = k.shape
    H = n_head
    if block_b is not None:
        assert B % block_b == 0
    if block_q is not None:
        assert Lq % block_q == 0

    kind = _device_kind()
    is_v7x = "v7" in kind
    if single_buffer_weights is None:
        single_buffer_weights = is_v7x

    w_dtype = jnp.bfloat16 if use_bf16_matmul else jnp.float32
    mm_dtype = jnp.bfloat16 if use_bf16_matmul else None

    # One-time wrapper-side layout work (all outside the kernel):
    #  * fold 1/sqrt(d_k) into Wq,
    #  * split every projection weight per head -> (E, H, D, d),
    #  * transpose activations to (B, E, L, D),
    #  * mask to int8.
    scale = jnp.float32(1.0 / (d_k ** 0.5))
    wq_h = (wq.astype(jnp.float32) * scale).reshape(Eq, D, H, d_k).transpose(0, 2, 1, 3).astype(w_dtype)
    wk_h = wk.reshape(Ek, D, H, d_k).transpose(0, 2, 1, 3).astype(w_dtype)
    wv_h = wv.reshape(Ek, D, H, d_v).transpose(0, 2, 1, 3).astype(w_dtype)
    wo_h = wo.reshape(Eq, H, d_v, D).astype(w_dtype)
    gamma2 = gamma.reshape(1, D).astype(jnp.float32)
    beta2 = beta.reshape(1, D).astype(jnp.float32)

    qT = jnp.transpose(q, (0, 2, 1, 3))     # (B, Eq, Lq, D)
    kT = jnp.transpose(k, (0, 2, 1, 3))     # (B, Ek, Lk, D)
    vT = jnp.transpose(v, (0, 2, 1, 3))
    mask_i8 = (mask != 0).astype(jnp.int8)

    est_fn = functools.partial(
        _vmem_estimate, Lk=Lk, Eq=Eq, Ek=Ek, H=H, d_k=d_k, d_v=d_v, D=D,
        mm_bytes=2 if use_bf16_matmul else 4,
        w_buffers=1 if single_buffer_weights else 2)
    bb, bq = _pick_blocks(B, Lq, lambda b, t: est_fn(b, t),
                          is_v7x=is_v7x, block_b=block_b, block_q=block_q)

    MiB = 1 << 20
    est_bytes = est_fn(bb, bq)
    vmem_limit = None
    if est_bytes > 12 * MiB:   # only raise the scoped limit when actually needed
        cap = (56 if is_v7x else 100) * MiB
        vmem_limit = int(min(cap, max(2 * est_bytes, 32 * MiB)))

    def wspec(shape):
        kwargs = {}
        if single_buffer_weights:
            kwargs["pipeline_mode"] = pl.Buffered(1)   # constant-index weights: 1 buffer
        return pl.BlockSpec(shape, lambda b, t: (0,) * len(shape), **kwargs)

    grid = (B // bb, Lq // bq)
    grid_spec = pltpu.PrefetchScalarGridSpec(
        num_scalar_prefetch=0,
        grid=grid,
        in_specs=[
            pl.BlockSpec((bb, Eq, bq, D), lambda b, t: (b, 0, t, 0)),   # q
            pl.BlockSpec((bb, Ek, Lk, D), lambda b, t: (b, 0, 0, 0)),   # k (revisited over t)
            pl.BlockSpec((bb, Ek, Lk, D), lambda b, t: (b, 0, 0, 0)),   # v
            pl.BlockSpec((bb, bq, Lk), lambda b, t: (b, t, 0)),         # mask (int8)
            wspec((Eq, H, D, d_k)),                                     # Wq (scaled)
            wspec((Ek, H, D, d_k)),                                     # Wk
            wspec((Ek, H, D, d_v)),                                     # Wv
            wspec((Eq, H, d_v, D)),                                     # Wo (fc)
            wspec((1, D)),                                              # LN gamma
            wspec((1, D)),                                              # LN beta
        ],
        out_specs=pl.BlockSpec((bb, bq, Eq * D), lambda b, t: (b, t, 0)),
    )

    kernel = functools.partial(_ensemble_mha_kernel,
                               n_head=H, d_k=d_k, d_v=d_v, mm_dtype=mm_dtype)

    out_flat = pl.pallas_call(
        kernel,
        out_shape=jax.ShapeDtypeStruct((B, Lq, Eq * D), jnp.float32),
        grid_spec=grid_spec,
        compiler_params=pltpu.CompilerParams(
            dimension_semantics=("parallel", "parallel"),
            vmem_limit_bytes=vmem_limit),
    )(qT, kT, vT, mask_i8, wq_h, wk_h, wv_h, wo_h, gamma2, beta2)

    return out_flat.reshape(B, Lq, Eq, D)


# -----------------------------------------------------------------------------
# Pure-JAX reference (mirrors the PyTorch forward exactly)
# -----------------------------------------------------------------------------
def reference(q, k, v, mask, wq, wk, wv, wo, gamma, beta, *, n_head, d_k, d_v):
    B, Lq, Eq, D = q.shape
    _, Lk, Ek, _ = k.shape
    temp = d_k ** 0.5

    q_prj = jnp.stack([q[:, :, i, :] @ wq[i] for i in range(Eq)], axis=2)
    k_prj = jnp.stack([k[:, :, j, :] @ wk[j] for j in range(Ek)], axis=2)
    v_prj = jnp.stack([v[:, :, j, :] @ wv[j] for j in range(Ek)], axis=2)
    v_tmp = (v_prj.reshape(B, Lk, Ek, n_head, d_v)
             .transpose(0, 3, 1, 2, 4).reshape(B, n_head, Lk * Ek, d_v))

    outs = []
    for i in range(Eq):
        q_ens = q_prj[:, :, i, :].reshape(B, Lq, n_head, d_k).transpose(0, 2, 1, 3)
        attn_j = []
        for j in range(Ek):
            k_ens = k_prj[:, :, j, :].reshape(B, Lk, n_head, d_k).transpose(0, 2, 1, 3)
            a = jnp.einsum('bhqd,bhkd->bhqk', q_ens / temp, k_ens)
            a = jnp.where(mask[:, None, :, :] == 0, -1e9, a)
            attn_j.append(a)
        attn = jnp.stack(attn_j, axis=-1).reshape(B, n_head, Lq, Lk * Ek)
        attn = jax.nn.softmax(attn, axis=-1)
        po = jnp.einsum('bhqk,bhkd->bhqd', attn, v_tmp)
        pre = po.transpose(0, 2, 1, 3).reshape(B, Lq, n_head * d_v)
        o = pre @ wo[i] + q[:, :, i, :]
        mean = o.mean(-1, keepdims=True)
        var = ((o - mean) ** 2).mean(-1, keepdims=True)
        o = (o - mean) / jnp.sqrt(var + 1e-6) * gamma[0] + beta[0]
        outs.append(o)
    return jnp.stack(outs, axis=2)


if __name__ == "__main__":
    # Small shapes consistent with the module's forward.  d_model=128 keeps the
    # per-ensemble output stores lane-dense (128-lane aligned).
    B, Lq, Lk = 2, 8, 8
    Eq, Ek = 2, 2            # n_ensemble_q, n_ensemble_k
    H, d_model = 2, 128      # n_head, d_model
    d_k = d_v = 16

    key = jax.random.PRNGKey(0)
    ks = jax.random.split(key, 8)

    q = jax.random.normal(ks[0], (B, Lq, Eq, d_model), jnp.float32)
    k = jax.random.normal(ks[1], (B, Lk, Ek, d_model), jnp.float32)
    v = jax.random.normal(ks[2], (B, Lk, Ek, d_model), jnp.float32)

    # Causal-style mask, broadcast over batch (1 = keep, 0 = masked).
    mask = (jnp.arange(Lk)[None, :] <= jnp.arange(Lq)[:, None]).astype(jnp.float32)
    mask = jnp.broadcast_to(mask, (B, Lq, Lk))

    # PyTorch Linear weights pre-transposed to (in, out), per ensemble.
    wq = 0.1 * jax.random.normal(ks[3], (Eq, d_model, H * d_k), jnp.float32)
    wk_w = 0.1 * jax.random.normal(ks[4], (Ek, d_model, H * d_k), jnp.float32)
    wv_w = 0.1 * jax.random.normal(ks[5], (Ek, d_model, H * d_v), jnp.float32)
    wo = 0.1 * jax.random.normal(ks[6], (Eq, H * d_v, d_model), jnp.float32)
    gamma = jnp.ones((1, d_model), jnp.float32)   # LayerNorm weight
    beta = jnp.zeros((1, d_model), jnp.float32)   # LayerNorm bias

    ref = reference(q, k, v, mask, wq, wk_w, wv_w, wo, gamma, beta,
                    n_head=H, d_k=d_k, d_v=d_v)

    # Exact-parity path (f32 MXU operands).
    out_f32 = ensemble_mha(q, k, v, mask, wq, wk_w, wv_w, wo, gamma, beta,
                           n_head=H, d_k=d_k, d_v=d_v, use_bf16_matmul=False)
    out_f32 = jax.block_until_ready(out_f32)
    assert out_f32.shape == (B, Lq, Eq, d_model)
    assert jnp.allclose(out_f32, ref, atol=1e-4, rtol=1e-4), \
        f"f32 max abs err {jnp.max(jnp.abs(out_f32 - ref))}"

    # Default fast path (bf16 MXU operands, f32 softmax / LayerNorm).
    out_bf16 = ensemble_mha(q, k, v, mask, wq, wk_w, wv_w, wo, gamma, beta,
                            n_head=H, d_k=d_k, d_v=d_v)
    out_bf16 = jax.block_until_ready(out_bf16)
    assert jnp.allclose(out_bf16, ref, atol=1e-1, rtol=1e-1), \
        f"bf16 max abs err {jnp.max(jnp.abs(out_bf16 - ref))}"

    print("KERNEL_OK")
</pallas_src>

<mosaic_0001>
module attributes {stable_mosaic.version = 11 : i64} {
  func.func @_ensemble_mha_kernel(%arg0: i32, %arg1: i32, %arg2: memref<2x2x8x128xf32, #tpu.memory_space<vmem>>, %arg3: memref<2x2x8x128xf32, #tpu.memory_space<vmem>>, %arg4: memref<2x2x8x128xf32, #tpu.memory_space<vmem>>, %arg5: memref<2x8x8xi8, #tpu.memory_space<vmem>>, %arg6: memref<2x2x128x16xf32, #tpu.memory_space<vmem>>, %arg7: memref<2x2x128x16xf32, #tpu.memory_space<vmem>>, %arg8: memref<2x2x128x16xf32, #tpu.memory_space<vmem>>, %arg9: memref<2x2x16x128xf32, #tpu.memory_space<vmem>>, %arg10: memref<1x128xf32, #tpu.memory_space<vmem>>, %arg11: memref<1x128xf32, #tpu.memory_space<vmem>>, %arg12: memref<2x8x256xf32, #tpu.memory_space<vmem>>) attributes {dimension_semantics = [#tpu.dimension_semantics<parallel>, #tpu.dimension_semantics<parallel>], iteration_bounds = array<i64: 1, 1>, scalar_prefetch = 0 : i64, scratch_operands = 0 : i64, tpu.core_type = #tpu.core_type<tc>, window_params = [{transform_indices = @transform_0, window_bounds = array<i64: 2, 2, 8, 128>}, {transform_indices = @transform_1, window_bounds = array<i64: 2, 2, 8, 128>}, {transform_indices = @transform_2, window_bounds = array<i64: 2, 2, 8, 128>}, {transform_indices = @transform_3, window_bounds = array<i64: 2, 8, 8>}, {pipeline_mode = #tpu.pipeline_mode<synchronous>, transform_indices = @transform_4, window_bounds = array<i64: 2, 2, 128, 16>}, {pipeline_mode = #tpu.pipeline_mode<synchronous>, transform_indices = @transform_5, window_bounds = array<i64: 2, 2, 128, 16>}, {pipeline_mode = #tpu.pipeline_mode<synchronous>, transform_indices = @transform_6, window_bounds = array<i64: 2, 2, 128, 16>}, {pipeline_mode = #tpu.pipeline_mode<synchronous>, transform_indices = @transform_7, window_bounds = array<i64: 2, 2, 16, 128>}, {pipeline_mode = #tpu.pipeline_mode<synchronous>, transform_indices = @transform_8, window_bounds = array<i64: 1, 128>}, {pipeline_mode = #tpu.pipeline_mode<synchronous>, transform_indices = @transform_9, window_bounds = array<i64: 1, 128>}, {transform_indices = @transform_10, window_bounds = array<i64: 2, 8, 256>}]} {
    %c0 = arith.constant 0 : index
    %c0_0 = arith.constant 0 : index
    %c0_1 = arith.constant 0 : index
    %c0_2 = arith.constant 0 : index
    %0 = vector.load %arg2[%c0, %c0_0, %c0_1, %c0_2] : memref<2x2x8x128xf32, #tpu.memory_space<vmem>>, vector<2x2x8x128xf32>
    %c0_3 = arith.constant 0 : index
    %c0_4 = arith.constant 0 : index
    %c0_5 = arith.constant 0 : index
    %c0_6 = arith.constant 0 : index
    %1 = vector.load %arg3[%c0_3, %c0_4, %c0_5, %c0_6] : memref<2x2x8x128xf32, #tpu.memory_space<vmem>>, vector<2x2x8x128xf32>
    %c0_7 = arith.constant 0 : index
    %c0_8 = arith.constant 0 : index
    %c0_9 = arith.constant 0 : index
    %c0_10 = arith.constant 0 : index
    %2 = vector.load %arg4[%c0_7, %c0_8, %c0_9, %c0_10] : memref<2x2x8x128xf32, #tpu.memory_space<vmem>>, vector<2x2x8x128xf32>
    %c0_11 = arith.constant 0 : index
    %c0_12 = arith.constant 0 : index
    %c0_13 = arith.constant 0 : index
    %c0_14 = arith.constant 0 : index
    %3 = vector.load %arg6[%c0_11, %c0_12, %c0_13, %c0_14] : memref<2x2x128x16xf32, #tpu.memory_space<vmem>>, vector<2x2x128x16xf32>
    %c0_15 = arith.constant 0 : index
    %c0_16 = arith.constant 0 : index
    %c0_17 = arith.constant 0 : index
    %c0_18 = arith.constant 0 : index
    %4 = vector.load %arg7[%c0_15, %c0_16, %c0_17, %c0_18] : memref<2x2x128x16xf32, #tpu.memory_space<vmem>>, vector<2x2x128x16xf32>
    %c0_19 = arith.constant 0 : index
    %c0_20 = arith.constant 0 : index
    %c0_21 = arith.constant 0 : index
    %c0_22 = arith.constant 0 : index
    %5 = vector.load %arg8[%c0_19, %c0_20, %c0_21, %c0_22] : memref<2x2x128x16xf32, #tpu.memory_space<vmem>>, vector<2x2x128x16xf32>
    %c0_23 = arith.constant 0 : index
    %c0_24 = arith.constant 0 : index
    %c0_25 = arith.constant 0 : index
    %c0_26 = arith.constant 0 : index
    %6 = vector.load %arg9[%c0_23, %c0_24, %c0_25, %c0_26] : memref<2x2x16x128xf32, #tpu.memory_space<vmem>>, vector<2x2x16x128xf32>
    %c0_27 = arith.constant 0 : index
    %c0_28 = arith.constant 0 : index
    %7 = vector.load %arg10[%c0_27, %c0_28] : memref<1x128xf32, #tpu.memory_space<vmem>>, vector<1x128xf32>
    %c0_29 = arith.constant 0 : index
    %c0_30 = arith.constant 0 : index
    %8 = vector.load %arg11[%c0_29, %c0_30] : memref<1x128xf32, #tpu.memory_space<vmem>>, vector<1x128xf32>
    %c0_31 = arith.constant 0 : index
    %c0_32 = arith.constant 0 : index
    %c0_33 = arith.constant 0 : index
    %9 = vector.load %arg5[%c0_31, %c0_32, %c0_33] : memref<2x8x8xi8, #tpu.memory_space<vmem>>, vector<2x8x8xi8>
    %c0_i8 = arith.constant 0 : i8
    %10 = vector.broadcast %c0_i8 : i8 to vector<2x8x8xi8>
    %11 = arith.cmpi ne, %9, %10 : vector<2x8x8xi8>
    %12 = vector.extract_strided_slice %1 {offsets = [0, 0, 0, 0], sizes = [2, 1, 8, 128], strides = [1, 1, 1, 1]} : vector<2x2x8x128xf32> to vector<2x1x8x128xf32>
    %13 = vector.shape_cast %12 : vector<2x1x8x128xf32> to vector<2x8x128xf32>
    %14 = vector.shape_cast %13 : vector<2x8x128xf32> to vector<16x128xf32>
    %15 = vector.extract_strided_slice %2 {offsets = [0, 0, 0, 0], sizes = [2, 1, 8, 128], strides = [1, 1, 1, 1]} : vector<2x2x8x128xf32> to vector<2x1x8x128xf32>
    %16 = vector.shape_cast %15 : vector<2x1x8x128xf32> to vector<2x8x128xf32>
    %17 = vector.shape_cast %16 : vector<2x8x128xf32> to vector<16x128xf32>
    %18 = vector.extract_strided_slice %4 {offsets = [0, 0, 0, 0], sizes = [1, 1, 128, 16], strides = [1, 1, 1, 1]} : vector<2x2x128x16xf32> to vector<1x1x128x16xf32>
    %19 = vector.shape_cast %18 : vector<1x1x128x16xf32> to vector<128x16xf32>
    %cst = arith.constant dense<0.000000e+00> : vector<16x16xf32>
    %20 = tpu.matmul %14, %19, %cst {dimension_numbers = #tpu.dot_dimension_numbers<[1], [0], [0], [1], [0, 0, 1, 1], [], []>} : vector<16x128xf32>, vector<128x16xf32>, vector<16x16xf32> -> vector<16x16xf32>
    %21 = vector.shape_cast %20 : vector<16x16xf32> to vector<2x8x16xf32>
    %22 = vector.extract_strided_slice %4 {offsets = [0, 1, 0, 0], sizes = [1, 1, 128, 16], strides = [1, 1, 1, 1]} : vector<2x2x128x16xf32> to vector<1x1x128x16xf32>
    %23 = vector.shape_cast %22 : vector<1x1x128x16xf32> to vector<128x16xf32>
    %cst_34 = arith.constant dense<0.000000e+00> : vector<16x16xf32>
    %24 = tpu.matmul %14, %23, %cst_34 {dimension_numbers = #tpu.dot_dimension_numbers<[1], [0], [0], [1], [0, 0, 1, 1], [], []>} : vector<16x128xf32>, vector<128x16xf32>, vector<16x16xf32> -> vector<16x16xf32>
    %25 = vector.shape_cast %24 : vector<16x16xf32> to vector<2x8x16xf32>
    %26 = vector.extract_strided_slice %5 {offsets = [0, 0, 0, 0], sizes = [1, 1, 128, 16], strides = [1, 1, 1, 1]} : vector<2x2x128x16xf32> to vector<1x1x128x16xf32>
    %27 = vector.shape_cast %26 : vector<1x1x128x16xf32> to vector<128x16xf32>
    %cst_35 = arith.constant dense<0.000000e+00> : vector<16x16xf32>
    %28 = tpu.matmul %17, %27, %cst_35 {dimension_numbers = #tpu.dot_dimension_numbers<[1], [0], [0], [1], [0, 0, 1, 1], [], []>} : vector<16x128xf32>, vector<128x16xf32>, vector<16x16xf32> -> vector<16x16xf32>
    %29 = vector.shape_cast %28 : vector<16x16xf32> to vector<2x8x16xf32>
    %30 = vector.extract_strided_slice %5 {offsets = [0, 1, 0, 0], sizes = [1, 1, 128, 16], strides = [1, 1, 1, 1]} : vector<2x2x128x16xf32> to vector<1x1x128x16xf32>
    %31 = vector.shape_cast %30 : vector<1x1x128x16xf32> to vector<128x16xf32>
    %cst_36 = arith.constant dense<0.000000e+00> : vector<16x16xf32>
    %32 = tpu.matmul %17, %31, %cst_36 {dimension_numbers = #tpu.dot_dimension_numbers<[1], [0], [0], [1], [0, 0, 1, 1], [], []>} : vector<16x128xf32>, vector<128x16xf32>, vector<16x16xf32> -> vector<16x16xf32>
    %33 = vector.shape_cast %32 : vector<16x16xf32> to vector<2x8x16xf32>
    %34 = vector.extract_strided_slice %1 {offsets = [0, 1, 0, 0], sizes = [2, 1, 8, 128], strides = [1, 1, 1, 1]} : vector<2x2x8x128xf32> to vector<2x1x8x128xf32>
    %35 = vector.shape_cast %34 : vector<2x1x8x128xf32> to vector<2x8x128xf32>
    %36 = vector.shape_cast %35 : vector<2x8x128xf32> to vector<16x128xf32>
    %37 = vector.extract_strided_slice %2 {offsets = [0, 1, 0, 0], sizes = [2, 1, 8, 128], strides = [1, 1, 1, 1]} : vector<2x2x8x128xf32> to vector<2x1x8x128xf32>
    %38 = vector.shape_cast %37 : vector<2x1x8x128xf32> to vector<2x8x128xf32>
    %39 = vector.shape_cast %38 : vector<2x8x128xf32> to vector<16x128xf32>
    %40 = vector.extract_strided_slice %4 {offsets = [1, 0, 0, 0], sizes = [1, 1, 128, 16], strides = [1, 1, 1, 1]} : vector<2x2x128x16xf32> to vector<1x1x128x16xf32>
    %41 = vector.shape_cast %40 : vector<1x1x128x16xf32> to vector<128x16xf32>
    %cst_37 = arith.constant dense<0.000000e+00> : vector<16x16xf32>
    %42 = tpu.matmul %36, %41, %cst_37 {dimension_numbers = #tpu.dot_dimension_numbers<[1], [0], [0], [1], [0, 0, 1, 1], [], []>} : vector<16x128xf32>, vector<128x16xf32>, vector<16x16xf32> -> vector<16x16xf32>
    %43 = vector.shape_cast %42 : vector<16x16xf32> to vector<2x8x16xf32>
    %44 = vector.extract_strided_slice %4 {offsets = [1, 1, 0, 0], sizes = [1, 1, 128, 16], strides = [1, 1, 1, 1]} : vector<2x2x128x16xf32> to vector<1x1x128x16xf32>
    %45 = vector.shape_cast %44 : vector<1x1x128x16xf32> to vector<128x16xf32>
    %cst_38 = arith.constant dense<0.000000e+00> : vector<16x16xf32>
    %46 = tpu.matmul %36, %45, %cst_38 {dimension_numbers = #tpu.dot_dimension_numbers<[1], [0], [0], [1], [0, 0, 1, 1], [], []>} : vector<16x128xf32>, vector<128x16xf32>, vector<16x16xf32> -> vector<16x16xf32>
    %47 = vector.shape_cast %46 : vector<16x16xf32> to vector<2x8x16xf32>
    %48 = vector.extract_strided_slice %5 {offsets = [1, 0, 0, 0], sizes = [1, 1, 128, 16], strides = [1, 1, 1, 1]} : vector<2x2x128x16xf32> to vector<1x1x128x16xf32>
    %49 = vector.shape_cast %48 : vector<1x1x128x16xf32> to vector<128x16xf32>
    %cst_39 = arith.constant dense<0.000000e+00> : vector<16x16xf32>
    %50 = tpu.matmul %39, %49, %cst_39 {dimension_numbers = #tpu.dot_dimension_numbers<[1], [0], [0], [1], [0, 0, 1, 1], [], []>} : vector<16x128xf32>, vector<128x16xf32>, vector<16x16xf32> -> vector<16x16xf32>
    %51 = vector.shape_cast %50 : vector<16x16xf32> to vector<2x8x16xf32>
    %52 = vector.extract_strided_slice %5 {offsets = [1, 1, 0, 0], sizes = [1, 1, 128, 16], strides = [1, 1, 1, 1]} : vector<2x2x128x16xf32> to vector<1x1x128x16xf32>
    %53 = vector.shape_cast %52 : vector<1x1x128x16xf32> to vector<128x16xf32>
    %cst_40 = arith.constant dense<0.000000e+00> : vector<16x16xf32>
    %54 = tpu.matmul %39, %53, %cst_40 {dimension_numbers = #tpu.dot_dimension_numbers<[1], [0], [0], [1], [0, 0, 1, 1], [], []>} : vector<16x128xf32>, vector<128x16xf32>, vector<16x16xf32> -> vector<16x16xf32>
    %55 = vector.shape_cast %54 : vector<16x16xf32> to vector<2x8x16xf32>
    %56 = vector.extract_strided_slice %0 {offsets = [0, 0, 0, 0], sizes = [2, 1, 8, 128], strides = [1, 1, 1, 1]} : vector<2x2x8x128xf32> to vector<2x1x8x128xf32>
    %57 = vector.shape_cast %56 : vector<2x1x8x128xf32> to vector<2x8x128xf32>
    %58 = vector.shape_cast %57 : vector<2x8x128xf32> to vector<16x128xf32>
    %59 = vector.extract_strided_slice %3 {offsets = [0, 0, 0, 0], sizes = [1, 1, 128, 16], strides = [1, 1, 1, 1]} : vector<2x2x128x16xf32> to vector<1x1x128x16xf32>
    %60 = vector.shape_cast %59 : vector<1x1x128x16xf32> to vector<128x16xf32>
    %cst_41 = arith.constant dense<0.000000e+00> : vector<16x16xf32>
    %61 = tpu.matmul %58, %60, %cst_41 {dimension_numbers = #tpu.dot_dimension_numbers<[1], [0], [0], [1], [0, 0, 1, 1], [], []>} : vector<16x128xf32>, vector<128x16xf32>, vector<16x16xf32> -> vector<16x16xf32>
    %62 = vector.shape_cast %61 : vector<16x16xf32> to vector<2x8x16xf32>
    "tpu.trace_start"() <{level = 10 : i32, message = "bqd,bkd->bqk"}> : () -> ()
    %cst_42 = arith.constant dense<0.000000e+00> : vector<2x8x8xf32>
    %63 = tpu.matmul %62, %21, %cst_42 {dimension_numbers = #tpu.dot_dimension_numbers<[2], [2], [1], [1], [0, 0, 0, 1, 1, 1], [0], [0]>} : vector<2x8x16xf32>, vector<2x8x16xf32>, vector<2x8x8xf32> -> vector<2x8x8xf32>
    %cst_43 = arith.constant -1.000000e+09 : f32
    "tpu.trace_stop"() : () -> ()
    %64 = vector.broadcast %cst_43 : f32 to vector<2x8x8xf32>
    %65 = arith.select %11, %63, %64 : vector<2x8x8xi1>, vector<2x8x8xf32>
    "tpu.trace_start"() <{level = 10 : i32, message = "bqd,bkd->bqk"}> : () -> ()
    %cst_44 = arith.constant dense<0.000000e+00> : vector<2x8x8xf32>
    %66 = tpu.matmul %62, %43, %cst_44 {dimension_numbers = #tpu.dot_dimension_numbers<[2], [2], [1], [1], [0, 0, 0, 1, 1, 1], [0], [0]>} : vector<2x8x16xf32>, vector<2x8x16xf32>, vector<2x8x8xf32> -> vector<2x8x8xf32>
    %cst_45 = arith.constant -1.000000e+09 : f32
    "tpu.trace_stop"() : () -> ()
    %67 = vector.broadcast %cst_45 : f32 to vector<2x8x8xf32>
    %68 = arith.select %11, %66, %67 : vector<2x8x8xi1>, vector<2x8x8xf32>
    %cst_46 = arith.constant dense<0xFF800000> : vector<2x8xf32>
    %69 = vector.multi_reduction <maximumf>, %65, %cst_46 [2] : vector<2x8x8xf32> to vector<2x8xf32>
    %70 = vector.shape_cast %69 : vector<2x8xf32> to vector<2x8x1xf32>
    %cst_47 = arith.constant dense<0xFF800000> : vector<2x8xf32>
    %71 = vector.multi_reduction <maximumf>, %68, %cst_47 [2] : vector<2x8x8xf32> to vector<2x8xf32>
    %72 = vector.shape_cast %71 : vector<2x8xf32> to vector<2x8x1xf32>
    %73 = arith.maximumf %70, %72 : vector<2x8x1xf32>
    %74 = vector.broadcast %73 : vector<2x8x1xf32> to vector<2x8x8xf32>
    %75 = arith.subf %65, %74 : vector<2x8x8xf32>
    %76 = math.exp %75 : vector<2x8x8xf32>
    %77 = vector.broadcast %73 : vector<2x8x1xf32> to vector<2x8x8xf32>
    %78 = arith.subf %68, %77 : vector<2x8x8xf32>
    %79 = math.exp %78 : vector<2x8x8xf32>
    %cst_48 = arith.constant dense<0.000000e+00> : vector<2x8xf32>
    %80 = vector.multi_reduction <add>, %76, %cst_48 [2] : vector<2x8x8xf32> to vector<2x8xf32>
    %81 = vector.shape_cast %80 : vector<2x8xf32> to vector<2x8x1xf32>
    %cst_49 = arith.constant dense<0.000000e+00> : vector<2x8xf32>
    %82 = vector.multi_reduction <add>, %79, %cst_49 [2] : vector<2x8x8xf32> to vector<2x8xf32>
    %83 = vector.shape_cast %82 : vector<2x8xf32> to vector<2x8x1xf32>
    %84 = arith.addf %81, %83 : vector<2x8x1xf32>
    %cst_50 = arith.constant 1.000000e+00 : f32
    %85 = vector.broadcast %cst_50 : f32 to vector<2x8x1xf32>
    %86 = arith.divf %85, %84 : vector<2x8x1xf32>
    %87 = vector.broadcast %86 : vector<2x8x1xf32> to vector<2x8x8xf32>
    %88 = arith.mulf %76, %87 : vector<2x8x8xf32>
    "tpu.trace_start"() <{level = 10 : i32, message = "bqk,bkd->bqd"}> : () -> ()
    %cst_51 = arith.constant dense<0.000000e+00> : vector<2x8x16xf32>
    %89 = tpu.matmul %88, %29, %cst_51 {dimension_numbers = #tpu.dot_dimension_numbers<[2], [1], [1], [2], [0, 0, 0, 1, 1, 2], [0], [0]>} : vector<2x8x8xf32>, vector<2x8x16xf32>, vector<2x8x16xf32> -> vector<2x8x16xf32>
    "tpu.trace_stop"() : () -> ()
    %90 = vector.broadcast %86 : vector<2x8x1xf32> to vector<2x8x8xf32>
    %91 = arith.mulf %79, %90 : vector<2x8x8xf32>
    "tpu.trace_start"() <{level = 10 : i32, message = "bqk,bkd->bqd"}> : () -> ()
    %cst_52 = arith.constant dense<0.000000e+00> : vector<2x8x16xf32>
    %92 = tpu.matmul %91, %51, %cst_52 {dimension_numbers = #tpu.dot_dimension_numbers<[2], [1], [1], [2], [0, 0, 0, 1, 1, 2], [0], [0]>} : vector<2x8x8xf32>, vector<2x8x16xf32>, vector<2x8x16xf32> -> vector<2x8x16xf32>
    "tpu.trace_stop"() : () -> ()
    %93 = arith.addf %89, %92 : vector<2x8x16xf32>
    %94 = vector.shape_cast %93 : vector<2x8x16xf32> to vector<16x16xf32>
    %95 = vector.extract_strided_slice %6 {offsets = [0, 0, 0, 0], sizes = [1, 1, 16, 128], strides = [1, 1, 1, 1]} : vector<2x2x16x128xf32> to vector<1x1x16x128xf32>
    %96 = vector.shape_cast %95 : vector<1x1x16x128xf32> to vector<16x128xf32>
    %cst_53 = arith.constant dense<0.000000e+00> : vector<16x128xf32>
    %97 = tpu.matmul %94, %96, %cst_53 {dimension_numbers = #tpu.dot_dimension_numbers<[1], [0], [0], [1], [0, 0, 1, 1], [], []>} : vector<16x16xf32>, vector<16x128xf32>, vector<16x128xf32> -> vector<16x128xf32>
    %98 = vector.extract_strided_slice %3 {offsets = [0, 1, 0, 0], sizes = [1, 1, 128, 16], strides = [1, 1, 1, 1]} : vector<2x2x128x16xf32> to vector<1x1x128x16xf32>
    %99 = vector.shape_cast %98 : vector<1x1x128x16xf32> to vector<128x16xf32>
    %cst_54 = arith.constant dense<0.000000e+00> : vector<16x16xf32>
    %100 = tpu.matmul %58, %99, %cst_54 {dimension_numbers = #tpu.dot_dimension_numbers<[1], [0], [0], [1], [0, 0, 1, 1], [], []>} : vector<16x128xf32>, vector<128x16xf32>, vector<16x16xf32> -> vector<16x16xf32>
    %101 = vector.shape_cast %100 : vector<16x16xf32> to vector<2x8x16xf32>
    "tpu.trace_start"() <{level = 10 : i32, message = "bqd,bkd->bqk"}> : () -> ()
    %cst_55 = arith.constant dense<0.000000e+00> : vector<2x8x8xf32>
    %102 = tpu.matmul %101, %25, %cst_55 {dimension_numbers = #tpu.dot_dimension_numbers<[2], [2], [1], [1], [0, 0, 0, 1, 1, 1], [0], [0]>} : vector<2x8x16xf32>, vector<2x8x16xf32>, vector<2x8x8xf32> -> vector<2x8x8xf32>
    %cst_56 = arith.constant -1.000000e+09 : f32
    "tpu.trace_stop"() : () -> ()
    %103 = vector.broadcast %cst_56 : f32 to vector<2x8x8xf32>
    %104 = arith.select %11, %102, %103 : vector<2x8x8xi1>, vector<2x8x8xf32>
    "tpu.trace_start"() <{level = 10 : i32, message = "bqd,bkd->bqk"}> : () -> ()
    %cst_57 = arith.constant dense<0.000000e+00> : vector<2x8x8xf32>
    %105 = tpu.matmul %101, %47, %cst_57 {dimension_numbers = #tpu.dot_dimension_numbers<[2], [2], [1], [1], [0, 0, 0, 1, 1, 1], [0], [0]>} : vector<2x8x16xf32>, vector<2x8x16xf32>, vector<2x8x8xf32> -> vector<2x8x8xf32>
    %cst_58 = arith.constant -1.000000e+09 : f32
    "tpu.trace_stop"() : () -> ()
    %106 = vector.broadcast %cst_58 : f32 to vector<2x8x8xf32>
    %107 = arith.select %11, %105, %106 : vector<2x8x8xi1>, vector<2x8x8xf32>
    %cst_59 = arith.constant dense<0xFF800000> : vector<2x8xf32>
    %108 = vector.multi_reduction <maximumf>, %104, %cst_59 [2] : vector<2x8x8xf32> to vector<2x8xf32>
    %109 = vector.shape_cast %108 : vector<2x8xf32> to vector<2x8x1xf32>
    %cst_60 = arith.constant dense<0xFF800000> : vector<2x8xf32>
    %110 = vector.multi_reduction <maximumf>, %107, %cst_60 [2] : vector<2x8x8xf32> to vector<2x8xf32>
    %111 = vector.shape_cast %110 : vector<2x8xf32> to vector<2x8x1xf32>
    %112 = arith.maximumf %109, %111 : vector<2x8x1xf32>
    %113 = vector.broadcast %112 : vector<2x8x1xf32> to vector<2x8x8xf32>
    %114 = arith.subf %104, %113 : vector<2x8x8xf32>
    %115 = math.exp %114 : vector<2x8x8xf32>
    %116 = vector.broadcast %112 : vector<2x8x1xf32> to vector<2x8x8xf32>
    %117 = arith.subf %107, %116 : vector<2x8x8xf32>
    %118 = math.exp %117 : vector<2x8x8xf32>
    %cst_61 = arith.constant dense<0.000000e+00> : vector<2x8xf32>
    %119 = vector.multi_reduction <add>, %115, %cst_61 [2] : vector<2x8x8xf32> to vector<2x8xf32>
    %120 = vector.shape_cast %119 : vector<2x8xf32> to vector<2x8x1xf32>
    %cst_62 = arith.constant dense<0.000000e+00> : vector<2x8xf32>
    %121 = vector.multi_reduction <add>, %118, %cst_62 [2] : vector<2x8x8xf32> to vector<2x8xf32>
    %122 = vector.shape_cast %121 : vector<2x8xf32> to vector<2x8x1xf32>
    %123 = arith.addf %120, %122 : vector<2x8x1xf32>
    %cst_63 = arith.constant 1.000000e+00 : f32
    %124 = vector.broadcast %cst_63 : f32 to vector<2x8x1xf32>
    %125 = arith.divf %124, %123 : vector<2x8x1xf32>
    %126 = vector.broadcast %125 : vector<2x8x1xf32> to vector<2x8x8xf32>
    %127 = arith.mulf %115, %126 : vector<2x8x8xf32>
    "tpu.trace_start"() <{level = 10 : i32, message = "bqk,bkd->bqd"}> : () -> ()
    %cst_64 = arith.constant dense<0.000000e+00> : vector<2x8x16xf32>
    %128 = tpu.matmul %127, %33, %cst_64 {dimension_numbers = #tpu.dot_dimension_numbers<[2], [1], [1], [2], [0, 0, 0, 1, 1, 2], [0], [0]>} : vector<2x8x8xf32>, vector<2x8x16xf32>, vector<2x8x16xf32> -> vector<2x8x16xf32>
    "tpu.trace_stop"() : () -> ()
    %129 = vector.broadcast %125 : vector<2x8x1xf32> to vector<2x8x8xf32>
    %130 = arith.mulf %118, %129 : vector<2x8x8xf32>
    "tpu.trace_start"() <{level = 10 : i32, message = "bqk,bkd->bqd"}> : () -> ()
    %cst_65 = arith.constant dense<0.000000e+00> : vector<2x8x16xf32>
    %131 = tpu.matmul %130, %55, %cst_65 {dimension_numbers = #tpu.dot_dimension_numbers<[2], [1], [1], [2], [0, 0, 0, 1, 1, 2], [0], [0]>} : vector<2x8x8xf32>, vector<2x8x16xf32>, vector<2x8x16xf32> -> vector<2x8x16xf32>
    "tpu.trace_stop"() : () -> ()
    %132 = arith.addf %128, %131 : vector<2x8x16xf32>
    %133 = vector.shape_cast %132 : vector<2x8x16xf32> to vector<16x16xf32>
    %134 = vector.extract_strided_slice %6 {offsets = [0, 1, 0, 0], sizes = [1, 1, 16, 128], strides = [1, 1, 1, 1]} : vector<2x2x16x128xf32> to vector<1x1x16x128xf32>
    %135 = vector.shape_cast %134 : vector<1x1x16x128xf32> to vector<16x128xf32>
    %cst_66 = arith.constant dense<0.000000e+00> : vector<16x128xf32>
    %136 = tpu.matmul %133, %135, %cst_66 {dimension_numbers = #tpu.dot_dimension_numbers<[1], [0], [0], [1], [0, 0, 1, 1], [], []>} : vector<16x16xf32>, vector<16x128xf32>, vector<16x128xf32> -> vector<16x128xf32>
    %137 = arith.addf %97, %136 : vector<16x128xf32>
    %138 = vector.shape_cast %57 : vector<2x8x128xf32> to vector<16x128xf32>
    %139 = arith.addf %137, %138 : vector<16x128xf32>
    %cst_67 = arith.constant dense<0.000000e+00> : vector<16xf32>
    %140 = vector.multi_reduction <add>, %139, %cst_67 [1] : vector<16x128xf32> to vector<16xf32>
    %141 = vector.shape_cast %140 : vector<16xf32> to vector<16x1xf32>
    %cst_68 = arith.constant 1.280000e+02 : f32
    %142 = vector.broadcast %cst_68 : f32 to vector<16x1xf32>
    %143 = arith.divf %141, %142 : vector<16x1xf32>
    %144 = vector.broadcast %143 : vector<16x1xf32> to vector<16x128xf32>
    %145 = arith.subf %139, %144 : vector<16x128xf32>
    %146 = arith.mulf %145, %145 : vector<16x128xf32>
    %cst_69 = arith.constant dense<0.000000e+00> : vector<16xf32>
    %147 = vector.multi_reduction <add>, %146, %cst_69 [1] : vector<16x128xf32> to vector<16xf32>
    %148 = vector.shape_cast %147 : vector<16xf32> to vector<16x1xf32>
    %cst_70 = arith.constant 1.280000e+02 : f32
    %149 = vector.broadcast %cst_70 : f32 to vector<16x1xf32>
    %150 = arith.divf %148, %149 : vector<16x1xf32>
    %cst_71 = arith.constant 9.99999997E-7 : f32
    %151 = vector.broadcast %cst_71 : f32 to vector<16x1xf32>
    %152 = arith.addf %150, %151 : vector<16x1xf32>
    %153 = math.rsqrt %152 : vector<16x1xf32>
    %154 = vector.broadcast %153 : vector<16x1xf32> to vector<16x128xf32>
    %155 = arith.mulf %145, %154 : vector<16x128xf32>
    %156 = vector.broadcast %7 : vector<1x128xf32> to vector<16x128xf32>
    %157 = arith.mulf %155, %156 : vector<16x128xf32>
    %158 = vector.broadcast %8 : vector<1x128xf32> to vector<16x128xf32>
    %159 = arith.addf %157, %158 : vector<16x128xf32>
    %160 = vector.shape_cast %159 : vector<16x128xf32> to vector<2x8x128xf32>
    %c0_72 = arith.constant 0 : index
    %c0_73 = arith.constant 0 : index
    %c0_74 = arith.constant 0 : index
    %161 = vector.load %arg12[%c0_72, %c0_73, %c0_74] : memref<2x8x256xf32, #tpu.memory_space<vmem>>, vector<2x8x128xf32>
    tpu.vector_store %arg12[%c0_72, %c0_73, %c0_74], %160 {strides = array<i32>} : memref<2x8x256xf32, #tpu.memory_space<vmem>>, vector<2x8x128xf32>,
    %162 = vector.extract_strided_slice %0 {offsets = [0, 1, 0, 0], sizes = [2, 1, 8, 128], strides = [1, 1, 1, 1]} : vector<2x2x8x128xf32> to vector<2x1x8x128xf32>
    %163 = vector.shape_cast %162 : vector<2x1x8x128xf32> to vector<2x8x128xf32>
    %164 = vector.shape_cast %163 : vector<2x8x128xf32> to vector<16x128xf32>
    %165 = vector.extract_strided_slice %3 {offsets = [1, 0, 0, 0], sizes = [1, 1, 128, 16], strides = [1, 1, 1, 1]} : vector<2x2x128x16xf32> to vector<1x1x128x16xf32>
    %166 = vector.shape_cast %165 : vector<1x1x128x16xf32> to vector<128x16xf32>
    %cst_75 = arith.constant dense<0.000000e+00> : vector<16x16xf32>
    %167 = tpu.matmul %164, %166, %cst_75 {dimension_numbers = #tpu.dot_dimension_numbers<[1], [0], [0], [1], [0, 0, 1, 1], [], []>} : vector<16x128xf32>, vector<128x16xf32>, vector<16x16xf32> -> vector<16x16xf32>
    %168 = vector.shape_cast %167 : vector<16x16xf32> to vector<2x8x16xf32>
    "tpu.trace_start"() <{level = 10 : i32, message = "bqd,bkd->bqk"}> : () -> ()
    %cst_76 = arith.constant dense<0.000000e+00> : vector<2x8x8xf32>
    %169 = tpu.matmul %168, %21, %cst_76 {dimension_numbers = #tpu.dot_dimension_numbers<[2], [2], [1], [1], [0, 0, 0, 1, 1, 1], [0], [0]>} : vector<2x8x16xf32>, vector<2x8x16xf32>, vector<2x8x8xf32> -> vector<2x8x8xf32>
    %cst_77 = arith.constant -1.000000e+09 : f32
    "tpu.trace_stop"() : () -> ()
    %170 = vector.broadcast %cst_77 : f32 to vector<2x8x8xf32>
    %171 = arith.select %11, %169, %170 : vector<2x8x8xi1>, vector<2x8x8xf32>
    "tpu.trace_start"() <{level = 10 : i32, message = "bqd,bkd->bqk"}> : () -> ()
    %cst_78 = arith.constant dense<0.000000e+00> : vector<2x8x8xf32>
    %172 = tpu.matmul %168, %43, %cst_78 {dimension_numbers = #tpu.dot_dimension_numbers<[2], [2], [1], [1], [0, 0, 0, 1, 1, 1], [0], [0]>} : vector<2x8x16xf32>, vector<2x8x16xf32>, vector<2x8x8xf32> -> vector<2x8x8xf32>
    %cst_79 = arith.constant -1.000000e+09 : f32
    "tpu.trace_stop"() : () -> ()
    %173 = vector.broadcast %cst_79 : f32 to vector<2x8x8xf32>
    %174 = arith.select %11, %172, %173 : vector<2x8x8xi1>, vector<2x8x8xf32>
    %cst_80 = arith.constant dense<0xFF800000> : vector<2x8xf32>
    %175 = vector.multi_reduction <maximumf>, %171, %cst_80 [2] : vector<2x8x8xf32> to vector<2x8xf32>
    %176 = vector.shape_cast %175 : vector<2x8xf32> to vector<2x8x1xf32>
    %cst_81 = arith.constant dense<0xFF800000> : vector<2x8xf32>
    %177 = vector.multi_reduction <maximumf>, %174, %cst_81 [2] : vector<2x8x8xf32> to vector<2x8xf32>
    %178 = vector.shape_cast %177 : vector<2x8xf32> to vector<2x8x1xf32>
    %179 = arith.maximumf %176, %178 : vector<2x8x1xf32>
    %180 = vector.broadcast %179 : vector<2x8x1xf32> to vector<2x8x8xf32>
    %181 = arith.subf %171, %180 : vector<2x8x8xf32>
    %182 = math.exp %181 : vector<2x8x8xf32>
    %183 = vector.broadcast %179 : vector<2x8x1xf32> to vector<2x8x8xf32>
    %184 = arith.subf %174, %183 : vector<2x8x8xf32>
    %185 = math.exp %184 : vector<2x8x8xf32>
    %cst_82 = arith.constant dense<0.000000e+00> : vector<2x8xf32>
    %186 = vector.multi_reduction <add>, %182, %cst_82 [2] : vector<2x8x8xf32> to vector<2x8xf32>
    %187 = vector.shape_cast %186 : vector<2x8xf32> to vector<2x8x1xf32>
    %cst_83 = arith.constant dense<0.000000e+00> : vector<2x8xf32>
    %188 = vector.multi_reduction <add>, %185, %cst_83 [2] : vector<2x8x8xf32> to vector<2x8xf32>
    %189 = vector.shape_cast %188 : vector<2x8xf32> to vector<2x8x1xf32>
    %190 = arith.addf %187, %189 : vector<2x8x1xf32>
    %cst_84 = arith.constant 1.000000e+00 : f32
    %191 = vector.broadcast %cst_84 : f32 to vector<2x8x1xf32>
    %192 = arith.divf %191, %190 : vector<2x8x1xf32>
    %193 = vector.broadcast %192 : vector<2x8x1xf32> to vector<2x8x8xf32>
    %194 = arith.mulf %182, %193 : vector<2x8x8xf32>
    "tpu.trace_start"() <{level = 10 : i32, message = "bqk,bkd->bqd"}> : () -> ()
    %cst_85 = arith.constant dense<0.000000e+00> : vector<2x8x16xf32>
    %195 = tpu.matmul %194, %29, %cst_85 {dimension_numbers = #tpu.dot_dimension_numbers<[2], [1], [1], [2], [0, 0, 0, 1, 1, 2], [0], [0]>} : vector<2x8x8xf32>, vector<2x8x16xf32>, vector<2x8x16xf32> -> vector<2x8x16xf32>
    "tpu.trace_stop"() : () -> ()
    %196 = vector.broadcast %192 : vector<2x8x1xf32> to vector<2x8x8xf32>
    %197 = arith.mulf %185, %196 : vector<2x8x8xf32>
    "tpu.trace_start"() <{level = 10 : i32, message = "bqk,bkd->bqd"}> : () -> ()
    %cst_86 = arith.constant dense<0.000000e+00> : vector<2x8x16xf32>
    %198 = tpu.matmul %197, %51, %cst_86 {dimension_numbers = #tpu.dot_dimension_numbers<[2], [1], [1], [2], [0, 0, 0, 1, 1, 2], [0], [0]>} : vector<2x8x8xf32>, vector<2x8x16xf32>, vector<2x8x16xf32> -> vector<2x8x16xf32>
    "tpu.trace_stop"() : () -> ()
    %199 = arith.addf %195, %198 : vector<2x8x16xf32>
    %200 = vector.shape_cast %199 : vector<2x8x16xf32> to vector<16x16xf32>
    %201 = vector.extract_strided_slice %6 {offsets = [1, 0, 0, 0], sizes = [1, 1, 16, 128], strides = [1, 1, 1, 1]} : vector<2x2x16x128xf32> to vector<1x1x16x128xf32>
    %202 = vector.shape_cast %201 : vector<1x1x16x128xf32> to vector<16x128xf32>
    %cst_87 = arith.constant dense<0.000000e+00> : vector<16x128xf32>
    %203 = tpu.matmul %200, %202, %cst_87 {dimension_numbers = #tpu.dot_dimension_numbers<[1], [0], [0], [1], [0, 0, 1, 1], [], []>} : vector<16x16xf32>, vector<16x128xf32>, vector<16x128xf32> -> vector<16x128xf32>
    %204 = vector.extract_strided_slice %3 {offsets = [1, 1, 0, 0], sizes = [1, 1, 128, 16], strides = [1, 1, 1, 1]} : vector<2x2x128x16xf32> to vector<1x1x128x16xf32>
    %205 = vector.shape_cast %204 : vector<1x1x128x16xf32> to vector<128x16xf32>
    %cst_88 = arith.constant dense<0.000000e+00> : vector<16x16xf32>
    %206 = tpu.matmul %164, %205, %cst_88 {dimension_numbers = #tpu.dot_dimension_numbers<[1], [0], [0], [1], [0, 0, 1, 1], [], []>} : vector<16x128xf32>, vector<128x16xf32>, vector<16x16xf32> -> vector<16x16xf32>
    %207 = vector.shape_cast %206 : vector<16x16xf32> to vector<2x8x16xf32>
    "tpu.trace_start"() <{level = 10 : i32, message = "bqd,bkd->bqk"}> : () -> ()
    %cst_89 = arith.constant dense<0.000000e+00> : vector<2x8x8xf32>
    %208 = tpu.matmul %207, %25, %cst_89 {dimension_numbers = #tpu.dot_dimension_numbers<[2], [2], [1], [1], [0, 0, 0, 1, 1, 1], [0], [0]>} : vector<2x8x16xf32>, vector<2x8x16xf32>, vector<2x8x8xf32> -> vector<2x8x8xf32>
    %cst_90 = arith.constant -1.000000e+09 : f32
    "tpu.trace_stop"() : () -> ()
    %209 = vector.broadcast %cst_90 : f32 to vector<2x8x8xf32>
    %210 = arith.select %11, %208, %209 : vector<2x8x8xi1>, vector<2x8x8xf32>
    "tpu.trace_start"() <{level = 10 : i32, message = "bqd,bkd->bqk"}> : () -> ()
    %cst_91 = arith.constant dense<0.000000e+00> : vector<2x8x8xf32>
    %211 = tpu.matmul %207, %47, %cst_91 {dimension_numbers = #tpu.dot_dimension_numbers<[2], [2], [1], [1], [0, 0, 0, 1, 1, 1], [0], [0]>} : vector<2x8x16xf32>, vector<2x8x16xf32>, vector<2x8x8xf32> -> vector<2x8x8xf32>
    %cst_92 = arith.constant -1.000000e+09 : f32
    "tpu.trace_stop"() : () -> ()
    %212 = vector.broadcast %cst_92 : f32 to vector<2x8x8xf32>
    %213 = arith.select %11, %211, %212 : vector<2x8x8xi1>, vector<2x8x8xf32>
    %cst_93 = arith.constant dense<0xFF800000> : vector<2x8xf32>
    %214 = vector.multi_reduction <maximumf>, %210, %cst_93 [2] : vector<2x8x8xf32> to vector<2x8xf32>
    %215 = vector.shape_cast %214 : vector<2x8xf32> to vector<2x8x1xf32>
    %cst_94 = arith.constant dense<0xFF800000> : vector<2x8xf32>
    %216 = vector.multi_reduction <maximumf>, %213, %cst_94 [2] : vector<2x8x8xf32> to vector<2x8xf32>
    %217 = vector.shape_cast %216 : vector<2x8xf32> to vector<2x8x1xf32>
    %218 = arith.maximumf %215, %217 : vector<2x8x1xf32>
    %219 = vector.broadcast %218 : vector<2x8x1xf32> to vector<2x8x8xf32>
    %220 = arith.subf %210, %219 : vector<2x8x8xf32>
    %221 = math.exp %220 : vector<2x8x8xf32>
    %222 = vector.broadcast %218 : vector<2x8x1xf32> to vector<2x8x8xf32>
    %223 = arith.subf %213, %222 : vector<2x8x8xf32>
    %224 = math.exp %223 : vector<2x8x8xf32>
    %cst_95 = arith.constant dense<0.000000e+00> : vector<2x8xf32>
    %225 = vector.multi_reduction <add>, %221, %cst_95 [2] : vector<2x8x8xf32> to vector<2x8xf32>
    %226 = vector.shape_cast %225 : vector<2x8xf32> to vector<2x8x1xf32>
    %cst_96 = arith.constant dense<0.000000e+00> : vector<2x8xf32>
    %227 = vector.multi_reduction <add>, %224, %cst_96 [2] : vector<2x8x8xf32> to vector<2x8xf32>
    %228 = vector.shape_cast %227 : vector<2x8xf32> to vector<2x8x1xf32>
    %229 = arith.addf %226, %228 : vector<2x8x1xf32>
    %cst_97 = arith.constant 1.000000e+00 : f32
    %230 = vector.broadcast %cst_97 : f32 to vector<2x8x1xf32>
    %231 = arith.divf %230, %229 : vector<2x8x1xf32>
    %232 = vector.broadcast %231 : vector<2x8x1xf32> to vector<2x8x8xf32>
    %233 = arith.mulf %221, %232 : vector<2x8x8xf32>
    "tpu.trace_start"() <{level = 10 : i32, message = "bqk,bkd->bqd"}> : () -> ()
    %cst_98 = arith.constant dense<0.000000e+00> : vector<2x8x16xf32>
    %234 = tpu.matmul %233, %33, %cst_98 {dimension_numbers = #tpu.dot_dimension_numbers<[2], [1], [1], [2], [0, 0, 0, 1, 1, 2], [0], [0]>} : vector<2x8x8xf32>, vector<2x8x16xf32>, vector<2x8x16xf32> -> vector<2x8x16xf32>
    "tpu.trace_stop"() : () -> ()
    %235 = vector.broadcast %231 : vector<2x8x1xf32> to vector<2x8x8xf32>
    %236 = arith.mulf %224, %235 : vector<2x8x8xf32>
    "tpu.trace_start"() <{level = 10 : i32, message = "bqk,bkd->bqd"}> : () -> ()
    %cst_99 = arith.constant dense<0.000000e+00> : vector<2x8x16xf32>
    %237 = tpu.matmul %236, %55, %cst_99 {dimension_numbers = #tpu.dot_dimension_numbers<[2], [1], [1], [2], [0, 0, 0, 1, 1, 2], [0], [0]>} : vector<2x8x8xf32>, vector<2x8x16xf32>, vector<2x8x16xf32> -> vector<2x8x16xf32>
    "tpu.trace_stop"() : () -> ()
    %238 = arith.addf %234, %237 : vector<2x8x16xf32>
    %239 = vector.shape_cast %238 : vector<2x8x16xf32> to vector<16x16xf32>
    %240 = vector.extract_strided_slice %6 {offsets = [1, 1, 0, 0], sizes = [1, 1, 16, 128], strides = [1, 1, 1, 1]} : vector<2x2x16x128xf32> to vector<1x1x16x128xf32>
    %241 = vector.shape_cast %240 : vector<1x1x16x128xf32> to vector<16x128xf32>
    %cst_100 = arith.constant dense<0.000000e+00> : vector<16x128xf32>
    %242 = tpu.matmul %239, %241, %cst_100 {dimension_numbers = #tpu.dot_dimension_numbers<[1], [0], [0], [1], [0, 0, 1, 1], [], []>} : vector<16x16xf32>, vector<16x128xf32>, vector<16x128xf32> -> vector<16x128xf32>
    %243 = arith.addf %203, %242 : vector<16x128xf32>
    %244 = vector.shape_cast %163 : vector<2x8x128xf32> to vector<16x128xf32>
    %245 = arith.addf %243, %244 : vector<16x128xf32>
    %cst_101 = arith.constant dense<0.000000e+00> : vector<16xf32>
    %246 = vector.multi_reduction <add>, %245, %cst_101 [1] : vector<16x128xf32> to vector<16xf32>
    %247 = vector.shape_cast %246 : vector<16xf32> to vector<16x1xf32>
    %cst_102 = arith.constant 1.280000e+02 : f32
    %248 = vector.broadcast %cst_102 : f32 to vector<16x1xf32>
    %249 = arith.divf %247, %248 : vector<16x1xf32>
    %250 = vector.broadcast %249 : vector<16x1xf32> to vector<16x128xf32>
    %251 = arith.subf %245, %250 : vector<16x128xf32>
    %252 = arith.mulf %251, %251 : vector<16x128xf32>
    %cst_103 = arith.constant dense<0.000000e+00> : vector<16xf32>
    %253 = vector.multi_reduction <add>, %252, %cst_103 [1] : vector<16x128xf32> to vector<16xf32>
    %254 = vector.shape_cast %253 : vector<16xf32> to vector<16x1xf32>
    %cst_104 = arith.constant 1.280000e+02 : f32
    %255 = vector.broadcast %cst_104 : f32 to vector<16x1xf32>
    %256 = arith.divf %254, %255 : vector<16x1xf32>
    %cst_105 = arith.constant 9.99999997E-7 : f32
    %257 = vector.broadcast %cst_105 : f32 to vector<16x1xf32>
    %258 = arith.addf %256, %257 : vector<16x1xf32>
    %259 = math.rsqrt %258 : vector<16x1xf32>
    %260 = vector.broadcast %259 : vector<16x1xf32> to vector<16x128xf32>
    %261 = arith.mulf %251, %260 : vector<16x128xf32>
    %262 = vector.broadcast %7 : vector<1x128xf32> to vector<16x128xf32>
    %263 = arith.mulf %261, %262 : vector<16x128xf32>
    %264 = vector.broadcast %8 : vector<1x128xf32> to vector<16x128xf32>
    %265 = arith.addf %263, %264 : vector<16x128xf32>
    %266 = vector.shape_cast %265 : vector<16x128xf32> to vector<2x8x128xf32>
    %c0_106 = arith.constant 0 : index
    %c0_107 = arith.constant 0 : index
    %c128 = arith.constant 128 : index
    %267 = vector.load %arg12[%c0_106, %c0_107, %c128] : memref<2x8x256xf32, #tpu.memory_space<vmem>>, vector<2x8x128xf32>
    tpu.vector_store %arg12[%c0_106, %c0_107, %c128], %266 {strides = array<i32>} : memref<2x8x256xf32, #tpu.memory_space<vmem>>, vector<2x8x128xf32>,
    return
  }
  func.func @transform_0(%arg0: i32, %arg1: i32) -> (i32, i32, i32, i32) {
    %c0_i32 = arith.constant 0 : i32
    %c0_i32_0 = arith.constant 0 : i32
    %c0_i32_1 = arith.constant 0 : i32
    return %arg0, %c0_i32, %arg1, %c0_i32_0 : i32, i32, i32, i32
  }
  func.func @transform_1(%arg0: i32, %arg1: i32) -> (i32, i32, i32, i32) {
    %c0_i32 = arith.constant 0 : i32
    %c0_i32_0 = arith.constant 0 : i32
    %c0_i32_1 = arith.constant 0 : i32
    %c0_i32_2 = arith.constant 0 : i32
    return %arg0, %c0_i32, %c0_i32_0, %c0_i32_1 : i32, i32, i32, i32
  }
  func.func @transform_2(%arg0: i32, %arg1: i32) -> (i32, i32, i32, i32) {
    %c0_i32 = arith.constant 0 : i32
    %c0_i32_0 = arith.constant 0 : i32
    %c0_i32_1 = arith.constant 0 : i32
    %c0_i32_2 = arith.constant 0 : i32
    return %arg0, %c0_i32, %c0_i32_0, %c0_i32_1 : i32, i32, i32, i32
  }
  func.func @transform_3(%arg0: i32, %arg1: i32) -> (i32, i32, i32) {
    %c0_i32 = arith.constant 0 : i32
    %c0_i32_0 = arith.constant 0 : i32
    return %arg0, %arg1, %c0_i32 : i32, i32, i32
  }
  func.func @transform_4(%arg0: i32, %arg1: i32) -> (i32, i32, i32, i32) {
    %c0_i32 = arith.constant 0 : i32
    %c0_i32_0 = arith.constant 0 : i32
    %c0_i32_1 = arith.constant 0 : i32
    %c0_i32_2 = arith.constant 0 : i32
    %c0_i32_3 = arith.constant 0 : i32
    return %c0_i32, %c0_i32_0, %c0_i32_1, %c0_i32_2 : i32, i32, i32, i32
  }
  func.func @transform_5(%arg0: i32, %arg1: i32) -> (i32, i32, i32, i32) {
    %c0_i32 = arith.constant 0 : i32
    %c0_i32_0 = arith.constant 0 : i32
    %c0_i32_1 = arith.constant 0 : i32
    %c0_i32_2 = arith.constant 0 : i32
    %c0_i32_3 = arith.constant 0 : i32
    return %c0_i32, %c0_i32_0, %c0_i32_1, %c0_i32_2 : i32, i32, i32, i32
  }
  func.func @transform_6(%arg0: i32, %arg1: i32) -> (i32, i32, i32, i32) {
    %c0_i32 = arith.constant 0 : i32
    %c0_i32_0 = arith.constant 0 : i32
    %c0_i32_1 = arith.constant 0 : i32
    %c0_i32_2 = arith.constant 0 : i32
    %c0_i32_3 = arith.constant 0 : i32
    return %c0_i32, %c0_i32_0, %c0_i32_1, %c0_i32_2 : i32, i32, i32, i32
  }
  func.func @transform_7(%arg0: i32, %arg1: i32) -> (i32, i32, i32, i32) {
    %c0_i32 = arith.constant 0 : i32
    %c0_i32_0 = arith.constant 0 : i32
    %c0_i32_1 = arith.constant 0 : i32
    %c0_i32_2 = arith.constant 0 : i32
    %c0_i32_3 = arith.constant 0 : i32
    return %c0_i32, %c0_i32_0, %c0_i32_1, %c0_i32_2 : i32, i32, i32, i32
  }
  func.func @transform_8(%arg0: i32, %arg1: i32) -> (i32, i32) {
    %c0_i32 = arith.constant 0 : i32
    %c0_i32_0 = arith.constant 0 : i32
    %c0_i32_1 = arith.constant 0 : i32
    return %c0_i32, %c0_i32_0 : i32, i32
  }
  func.func @transform_9(%arg0: i32, %arg1: i32) -> (i32, i32) {
    %c0_i32 = arith.constant 0 : i32
    %c0_i32_0 = arith.constant 0 : i32
    %c0_i32_1 = arith.constant 0 : i32
    return %c0_i32, %c0_i32_0 : i32, i32
  }
  func.func @transform_10(%arg0: i32, %arg1: i32) -> (i32, i32, i32) {
    %c0_i32 = arith.constant 0 : i32
    %c0_i32_0 = arith.constant 0 : i32
    return %arg0, %arg1, %c0_i32 : i32, i32, i32
  }
}

</mosaic_0001>

<bundles_post_ra>
// kernel: tpu_custom_call.1
= control target key start
LH: loop header
LB: loop body
LE: loop exit
PB: predicated region body
PF: predicated region fallthrough
CT: control target
= control target key end

     0   :  { %s6662_s0 = inlined_call_operand.vmem [shape: f32[2,2,8,128], index: 0, kind: input, shape index: {}]   ;;  %s6663_s1 = inlined_call_operand.vmem [shape: f32[2,2,8,128], index: 1, kind: input, shape index: {}]   ;;  %s6664_s2 = inlined_call_operand.vmem [shape: f32[2,2,8,128], index: 2, kind: input, shape index: {}]   ;;  %s6665_s3 = inlined_call_operand.vmem [shape: s8[2,8,8], index: 3, kind: input, shape index: {}]   ;;  %s6666_s4 = inlined_call_operand.vmem [shape: f32[2,2,128,16], index: 4, kind: input, shape index: {}]   ;;  %s6667_s5 = inlined_call_operand.vmem [shape: f32[2,2,128,16], index: 5, kind: input, shape index: {}]   ;;  %s6668_s6 = inlined_call_operand.vmem [shape: f32[2,2,128,16], index: 6, kind: input, shape index: {}]   ;;  %s6669_s7 = inlined_call_operand.vmem [shape: f32[2,2,16,128], index: 7, kind: input, shape index: {}]   ;;  %s6670_s8 = inlined_call_operand.vmem [shape: f32[1,128], index: 8, kind: input, shape index: {}]   ;;  %s6671_s9 = inlined_call_operand.vmem [shape: f32[1,128], index: 9, kind: input, shape index: {}]   ;;  %s6672_s10 = inlined_call_operand.hbm [shape: f32[2,8,256], index: 10, kind: output, shape index: {}]  }
   0x1   :  { %v114_v0 = vld [vmem:[%s6667_s5] sm:$0xff]  ;;  %v115_v1 = vld [vmem:[%s6667_s5 + $0x8] sm:$0xff]  ;;  %v116_v2 = vld [vmem:[%s6667_s5 + $0x10] sm:$0xff] }
   0x2   :  { %v5083_v3 = vpack.c.bf16 %v115_v1, %v114_v0  ;;  %v117_v4 = vld [vmem:[%s6667_s5 + $0x18] sm:$0xff]  ;;  %v118_v6 = vld [vmem:[%s6667_s5 + $0x20] sm:$0xff]  ;;  %v119_v7 = vld [vmem:[%s6667_s5 + $0x28] sm:$0xff] }
   0x3   :  { %v5087_v5 = vpack.c.bf16 %v117_v4, %v116_v2  ;;  %v5091_v8 = vpack.c.bf16 %v119_v7, %v118_v6  ;;  %v42_v9 = vld [vmem:[%s6663_s1] sm:$0xff]  ;;  %v120_v10 = vld [vmem:[%s6667_s5 + $0x30] sm:$0xff]  ;;  %v121_v11 = vld [vmem:[%s6667_s5 + $0x38] sm:$0xff] }
   0x4   :  { %5084 = vmatprep.subr.bf16.mxu0 %v5083_v3  ;;  %4507 = vmatprep.mubr.f32.mxu0 %v42_v9  ;;  %v5095_v12 = vpack.c.bf16 %v121_v11, %v120_v10  ;;  %v122_v13 = vld [vmem:[%s6667_s5 + $0x40] sm:$0xff]  ;;  %v123_v14 = vld [vmem:[%s6667_s5 + $0x48] sm:$0xff]  ;;  %v124_v16 = vld [vmem:[%s6667_s5 + $0x50] sm:$0xff] }
   0x5   :  { %5086 = vmatpush3.bf16.msra.mxu0 %v5083_v3  ;;  %4542 = vmatprep.mubr.f32.mxu1 %v42_v9  ;;  %v5099_v15 = vpack.c.bf16 %v123_v14, %v122_v13  ;;  %v125_v17 = vld [vmem:[%s6667_s5 + $0x58] sm:$0xff]  ;;  %v126_v19 = vld [vmem:[%s6667_s5 + $0x60] sm:$0xff]  ;;  %v127_v20 = vld [vmem:[%s6667_s5 + $0x68] sm:$0xff] }
   0x6   :  { %5088 = vmatprep.subr.bf16.mxu0 %v5087_v5  ;;  %v5103_v18 = vpack.c.bf16 %v125_v17, %v124_v16  ;;  %v130_v21 = vld [vmem:[%s6667_s5 + $0x80] sm:$0xff]  ;;  %v5107_v22 = vpack.c.bf16 %v127_v20, %v126_v19  ;;  %v128_v23 = vld [vmem:[%s6667_s5 + $0x70] sm:$0xff]  ;;  %v131_v24 = vld [vmem:[%s6667_s5 + $0x88] sm:$0xff] }
   0x7   :  { %v129_v25 = vld [vmem:[%s6667_s5 + $0x78] sm:$0xff]  ;;  %v5115_v26 = vpack.c.bf16 %v131_v24, %v130_v21  ;;  %v132_v27 = vld [vmem:[%s6667_s5 + $0x90] sm:$0xff]  ;;  %v134_v30 = vld [vmem:[%s6667_s5 + $0xa0] sm:$0xff] }
   0x8   :  { %v133_v28 = vld [vmem:[%s6667_s5 + $0x98] sm:$0xff]  ;;  %v135_v31 = vld [vmem:[%s6667_s5 + $0xa8] sm:$0xff]  ;;  %v5111_v32 = vpack.c.bf16 %v129_v25, %v128_v23  ;;  %v178_v33 = vld [vmem:[%s6668_s6] sm:$0xff] }
   0x9   :  { %5090 = vmatpush3.bf16.msra.mxu0 %v5087_v5  ;;  %v5119_v29 = vpack.c.bf16 %v133_v28, %v132_v27  ;;  %5116 = vmatprep.subr.bf16.mxu1 %v5115_v26  ;;  %v179_v34 = vld [vmem:[%s6668_s6 + $0x8] sm:$0xff]  ;;  %v5123_v35 = vpack.c.bf16 %v135_v31, %v134_v30  ;;  %v136_v36 = vld [vmem:[%s6667_s5 + $0xb0] sm:$0xff]  ;;  %v137_v37 = vld [vmem:[%s6667_s5 + $0xb8] sm:$0xff] }
   0xa   :  { %5092 = vmatprep.subr.bf16.mxu0 %v5091_v8  ;;  %5118 = vmatpush3.bf16.msra.mxu1 %v5115_v26  ;;  %v5147_v38 = vpack.c.bf16 %v179_v34, %v178_v33  ;;  %v180_v39 = vld [vmem:[%s6668_s6 + $0x10] sm:$0xff]  ;;  %v181_v40 = vld [vmem:[%s6668_s6 + $0x18] sm:$0xff]  ;;  %v5127_v41 = vpack.c.bf16 %v137_v37, %v136_v36  ;;  %v138_v42 = vld [vmem:[%s6667_s5 + $0xc0] sm:$0xff] }
   0xb   :  { %5120 = vmatprep.subr.bf16.mxu1 %v5119_v29  ;;  %v139_v43 = vld [vmem:[%s6667_s5 + $0xc8] sm:$0xff]  ;;  %v5748_v44 = vld [vmem:[%s6663_s1 + $0x10] sm:$0xff]  ;;  %v5151_v45 = vpack.c.bf16 %v181_v40, %v180_v39  ;;  %v5753_v46 = vld [vmem:[%s6664_s2] sm:$0xff] }
   0xc   :  { %v182_v47 = vld [vmem:[%s6668_s6 + $0x20] sm:$0xff]  ;;  %v183_v48 = vld [vmem:[%s6668_s6 + $0x28] sm:$0xff]  ;;  %v5131_v49 = vpack.c.bf16 %v139_v43, %v138_v42  ;;  %v140_v50 = vld [vmem:[%s6667_s5 + $0xd0] sm:$0xff] }
   0xd   :  { %5094 = vmatpush3.bf16.msra.mxu0 %v5091_v8  ;;  %v141_v51 = vld [vmem:[%s6667_s5 + $0xd8] sm:$0xff]  ;;  %v5155_v52 = vpack.c.bf16 %v183_v48, %v182_v47  ;;  %v184_v53 = vld [vmem:[%s6668_s6 + $0x30] sm:$0xff]  ;;  %v142_v56 = vld [vmem:[%s6667_s5 + $0xe0] sm:$0xff] }
   0xe   :  { %5096 = vmatprep.subr.bf16.mxu0 %v5095_v12  ;;  %5122 = vmatpush3.bf16.msra.mxu1 %v5119_v29  ;;  %v185_v54 = vld [vmem:[%s6668_s6 + $0x38] sm:$0xff]  ;;  %v5135_v55 = vpack.c.bf16 %v141_v51, %v140_v50  ;;  %v143_v57 = vld [vmem:[%s6667_s5 + $0xe8] sm:$0xff]  ;;  %v186_v59 = vld [vmem:[%s6668_s6 + $0x40] sm:$0xff] }
   0xf   :  { %5124 = vmatprep.subr.bf16.mxu1 %v5123_v35  ;;  %v5159_v58 = vpack.c.bf16 %v185_v54, %v184_v53  ;;  %v187_v60 = vld [vmem:[%s6668_s6 + $0x48] sm:$0xff]  ;;  %v5139_v61 = vpack.c.bf16 %v143_v57, %v142_v56  ;;  %v144_v62 = vld [vmem:[%s6667_s5 + $0xf0] sm:$0xff]  ;;  %v145_v63 = vld [vmem:[%s6667_s5 + $0xf8] sm:$0xff] }
  0x10   :  { %v5163_v0 = vpack.c.bf16 %v187_v60, %v186_v59  ;;  %v188_v1 = vld [vmem:[%s6668_s6 + $0x50] sm:$0xff]  ;;  %v189_v2 = vld [vmem:[%s6668_s6 + $0x58] sm:$0xff]  ;;  %v5143_v3 = vpack.c.bf16 %v145_v63, %v144_v62  ;;  %v194_v4 = vld [vmem:[%s6668_s6 + $0x80] sm:$0xff] }
  0x11   :  { %5098 = vmatpush3.bf16.msra.mxu0 %v5095_v12  ;;  %v195_v5 = vld [vmem:[%s6668_s6 + $0x88] sm:$0xff]  ;;  %v5167_v6 = vpack.c.bf16 %v189_v2, %v188_v1  ;;  %v190_v7 = vld [vmem:[%s6668_s6 + $0x60] sm:$0xff]  ;;  %v196_v10 = vld [vmem:[%s6668_s6 + $0x90] sm:$0xff] }
  0x12   :  { %5100 = vmatprep.subr.bf16.mxu0 %v5099_v15  ;;  %5126 = vmatpush3.bf16.msra.mxu1 %v5123_v35  ;;  %v191_v8 = vld [vmem:[%s6668_s6 + $0x68] sm:$0xff]  ;;  %v5179_v9 = vpack.c.bf16 %v195_v5, %v194_v4  ;;  %v197_v11 = vld [vmem:[%s6668_s6 + $0x98] sm:$0xff] }
  0x13   :  { %5128 = vmatprep.subr.bf16.mxu1 %v5127_v41 }
  0x15   :  { %5102 = vmatpush3.bf16.msra.mxu0 %v5099_v15 }
  0x16   :  { %5104 = vmatprep.subr.bf16.mxu0 %v5103_v18  ;;  %5130 = vmatpush3.bf16.msra.mxu1 %v5127_v41 }
  0x17   :  { %5132 = vmatprep.subr.bf16.mxu1 %v5131_v49 }
  0x19   :  { %5106 = vmatpush3.bf16.msra.mxu0 %v5103_v18 }
  0x1a   :  { %5108 = vmatprep.subr.bf16.mxu0 %v5107_v22  ;;  %5134 = vmatpush3.bf16.msra.mxu1 %v5131_v49 }
  0x1b   :  { %5136 = vmatprep.subr.bf16.mxu1 %v5135_v55 }
  0x1d   :  { %5110 = vmatpush3.bf16.msra.mxu0 %v5107_v22 }
  0x1e   :  { %5112 = vmatprep.subr.bf16.mxu0 %v5111_v32  ;;  %5138 = vmatpush3.bf16.msra.mxu1 %v5135_v55 }
  0x1f   :  { %5140 = vmatprep.subr.bf16.mxu1 %v5139_v61 }
  0x21   :  { %5114 = vmatpush3.bf16.msra.mxu0 %v5111_v32 }
  0x22   :  { %5148 = vmatprep.subr.bf16.mxu0 %v5147_v38  ;;  %5142 = vmatpush3.bf16.msra.mxu1 %v5139_v61 }
  0x23   :  { %5144 = vmatprep.subr.bf16.mxu1 %v5143_v3 }
  0x24   :  { %4508 = vmatmul.mubr.f32.vlgmr.msra.gmra.mrb[0].mxu0 %v5748_v44 }
  0x25   :  { %5150 = vmatpush3.bf16.msra.mxu0 %v5147_v38  ;;  %4577 = vmatprep.mubr.f32.mxu0 %v5753_v46 }
  0x26   :  { %5152 = vmatprep.subr.bf16.mxu0 %v5151_v45 }
  0x29   :  { %5154 = vmatpush3.bf16.msra.mxu0 %v5151_v45 }
  0x2a   :  { %5156 = vmatprep.subr.bf16.mxu0 %v5155_v52 }
  0x2d   :  { %5158 = vmatpush3.bf16.msra.mxu0 %v5155_v52 }
  0x2e   :  { %5160 = vmatprep.subr.bf16.mxu0 %v5159_v58 }
  0x31   :  { %5162 = vmatpush3.bf16.msra.mxu0 %v5159_v58 }
  0x32   :  { %5164 = vmatprep.subr.bf16.mxu0 %v5163_v0 }
  0x33   :  { %15 = vsyncpa [#allocation3], 0  ;;  %v5171_v12 = vpack.c.bf16 %v191_v8, %v190_v7  ;;  %5146 = vmatpush3.bf16.msra.mxu1 %v5143_v3  ;;  %v192_v13 = vld [vmem:[%s6668_s6 + $0x70] sm:$0xff]  ;;  %v193_v14 = vld [vmem:[%s6668_s6 + $0x78] sm:$0xff]  ;;  %v5183_v15 = vpack.c.bf16 %v197_v11, %v196_v10  ;;  %vm931_vm0 = vcmask 130048   ;;  %vm5592_vm1 = vmmov 0  }
  0x34   :  { %5180 = vmatprep.subr.bf16.mxu1 %v5179_v9  ;;  %v198_v16 = vld [vmem:[%s6668_s6 + $0xa0] sm:$0xff]  ;;  %v199_v17 = vld [vmem:[%s6668_s6 + $0xa8] sm:$0xff]  ;;  %v5175_v18 = vpack.c.bf16 %v193_v14, %v192_v13  ;;  %v200_v22 = vld [vmem:[%s6668_s6 + $0xb0] sm:$0xff]  ;;  %vm1240_vm5 = vcmask 64512  }
  0x35   :  { %5166 = vmatpush3.bf16.msra.mxu0 %v5163_v0  ;;  %v146_v19 = vld [vmem:[%s6667_s5 + $0x100] sm:$0xff]  ;;  %v147_v20 = vld [vmem:[%s6667_s5 + $0x108] sm:$0xff]  ;;  %v5187_v21 = vpack.c.bf16 %v199_v17, %v198_v16  ;;  %v201_v23 = vld [vmem:[%s6668_s6 + $0xb8] sm:$0xff] }
  0x36   :  { %5168 = vmatprep.subr.bf16.mxu0 %v5167_v6  ;;  %4543 = vmatmul.mubr.f32.vlgmr.msra.gmra.mrb[0].mxu1 %v5748_v44  ;;  %v5211_v24 = vpack.c.bf16 %v147_v20, %v146_v19  ;;  %v148_v25 = vld [vmem:[%s6667_s5 + $0x110] sm:$0xff]  ;;  %v149_v26 = vld [vmem:[%s6667_s5 + $0x118] sm:$0xff]  ;;  %v5191_v27 = vpack.c.bf16 %v201_v23, %v200_v22  ;;  %v202_v28 = vld [vmem:[%s6668_s6 + $0xc0] sm:$0xff] }
  0x37   :  { %5182 = vmatpush3.bf16.msra.mxu1 %v5179_v9  ;;  %4612 = vmatprep.mubr.f32.mxu1 %v5753_v46  ;;  %v203_v29 = vld [vmem:[%s6668_s6 + $0xc8] sm:$0xff]  ;;  %v5858_v30 = vld [vmem:[%s6664_s2 + $0x10] sm:$0xff]  ;;  %v5215_v31 = vpack.c.bf16 %v149_v26, %v148_v25  ;;  %v150_v33 = vld [vmem:[%s6667_s5 + $0x120] sm:$0xff] }
  0x38   :  { %5184 = vmatprep.subr.bf16.mxu1 %v5183_v15  ;;  %v5863_v32 = vld [vmem:[%s6663_s1 + $0x8] sm:$0xff]  ;;  %v5195_v35 = vpack.c.bf16 %v203_v29, %v202_v28  ;;  %v204_v36 = vld [vmem:[%s6668_s6 + $0xd0] sm:$0xff]  ;;  %v205_v37 = vld [vmem:[%s6668_s6 + $0xd8] sm:$0xff] }
  0x39   :  { %5170 = vmatpush3.bf16.msra.mxu0 %v5167_v6  ;;  %v151_v34 = vld [vmem:[%s6667_s5 + $0x128] sm:$0xff]  ;;  %v152_v39 = vld [vmem:[%s6667_s5 + $0x130] sm:$0xff]  ;;  %v153_v40 = vld [vmem:[%s6667_s5 + $0x138] sm:$0xff]  ;;  %v5199_v41 = vpack.c.bf16 %v205_v37, %v204_v36 }
  0x3a   :  { %5172 = vmatprep.subr.bf16.mxu0 %v5171_v12  ;;  %v5219_v38 = vpack.c.bf16 %v151_v34, %v150_v33  ;;  %v206_v42 = vld [vmem:[%s6668_s6 + $0xe0] sm:$0xff]  ;;  %v207_v43 = vld [vmem:[%s6668_s6 + $0xe8] sm:$0xff]  ;;  %v5223_v44 = vpack.c.bf16 %v153_v40, %v152_v39  ;;  %v208_v48 = vld [vmem:[%s6668_s6 + $0xf0] sm:$0xff] }
  0x3b   :  { %5186 = vmatpush3.bf16.msra.mxu1 %v5183_v15  ;;  %v154_v45 = vld [vmem:[%s6667_s5 + $0x140] sm:$0xff]  ;;  %v155_v46 = vld [vmem:[%s6667_s5 + $0x148] sm:$0xff]  ;;  %v5203_v47 = vpack.c.bf16 %v207_v43, %v206_v42  ;;  %v209_v49 = vld [vmem:[%s6668_s6 + $0xf8] sm:$0xff] }
  0x3c   :  { %5188 = vmatprep.subr.bf16.mxu1 %v5187_v21  ;;  %v5227_v50 = vpack.c.bf16 %v155_v46, %v154_v45  ;;  %v156_v51 = vld [vmem:[%s6667_s5 + $0x150] sm:$0xff]  ;;  %v157_v52 = vld [vmem:[%s6667_s5 + $0x158] sm:$0xff]  ;;  %v5207_v53 = vpack.c.bf16 %v209_v49, %v208_v48  ;;  %v162_v54 = vld [vmem:[%s6667_s5 + $0x180] sm:$0xff] }
  0x3d   :  { %5174 = vmatpush3.bf16.msra.mxu0 %v5171_v12  ;;  %v163_v55 = vld [vmem:[%s6667_s5 + $0x188] sm:$0xff]  ;;  %v5231_v56 = vpack.c.bf16 %v157_v52, %v156_v51  ;;  %v158_v57 = vld [vmem:[%s6667_s5 + $0x160] sm:$0xff]  ;;  %v164_v60 = vld [vmem:[%s6667_s5 + $0x190] sm:$0xff] }
  0x3e   :  { %5176 = vmatprep.subr.bf16.mxu0 %v5175_v18  ;;  %v159_v58 = vld [vmem:[%s6667_s5 + $0x168] sm:$0xff]  ;;  %v5243_v59 = vpack.c.bf16 %v163_v55, %v162_v54  ;;  %v165_v61 = vld [vmem:[%s6667_s5 + $0x198] sm:$0xff]  ;;  %v160_v63 = vld [vmem:[%s6667_s5 + $0x170] sm:$0xff] }
  0x3f   :  { %5190 = vmatpush3.bf16.msra.mxu1 %v5187_v21  ;;  %v5235_v62 = vpack.c.bf16 %v159_v58, %v158_v57  ;;  %v161_v0 = vld [vmem:[%s6667_s5 + $0x178] sm:$0xff]  ;;  %v5247_v1 = vpack.c.bf16 %v165_v61, %v164_v60  ;;  %v166_v2 = vld [vmem:[%s6667_s5 + $0x1a0] sm:$0xff]  ;;  %v167_v3 = vld [vmem:[%s6667_s5 + $0x1a8] sm:$0xff] }
  0x40   :  { %5192 = vmatprep.subr.bf16.mxu1 %v5191_v27  ;;  %v5239_v4 = vpack.c.bf16 %v161_v0, %v160_v63  ;;  %v210_v5 = vld [vmem:[%s6668_s6 + $0x100] sm:$0xff]  ;;  %v211_v6 = vld [vmem:[%s6668_s6 + $0x108] sm:$0xff]  ;;  %v5251_v7 = vpack.c.bf16 %v167_v3, %v166_v2  ;;  %v168_v8 = vld [vmem:[%s6667_s5 + $0x1b0] sm:$0xff] }
  0x41   :  { %5178 = vmatpush3.bf16.msra.mxu0 %v5175_v18  ;;  %v169_v9 = vld [vmem:[%s6667_s5 + $0x1b8] sm:$0xff]  ;;  %v5275_v10 = vpack.c.bf16 %v211_v6, %v210_v5  ;;  %v212_v11 = vld [vmem:[%s6668_s6 + $0x110] sm:$0xff]  ;;  %v170_v14 = vld [vmem:[%s6667_s5 + $0x1c0] sm:$0xff] }
  0x42   :  { %5212 = vmatprep.subr.bf16.mxu0 %v5211_v24  ;;  %v213_v12 = vld [vmem:[%s6668_s6 + $0x118] sm:$0xff]  ;;  %v5255_v13 = vpack.c.bf16 %v169_v9, %v168_v8  ;;  %v171_v15 = vld [vmem:[%s6667_s5 + $0x1c8] sm:$0xff]  ;;  %v214_v19 = vld [vmem:[%s6668_s6 + $0x120] sm:$0xff] }
  0x43   :  { %5194 = vmatpush3.bf16.msra.mxu1 %v5191_v27  ;;  %v5968_v16 = vld [vmem:[%s6663_s1 + $0x18] sm:$0xff]  ;;  %v5279_v17 = vpack.c.bf16 %v213_v12, %v212_v11  ;;  %v5973_v18 = vld [vmem:[%s6664_s2 + $0x8] sm:$0xff]  ;;  %v5259_v21 = vpack.c.bf16 %v171_v15, %v170_v14  ;;  %v172_v22 = vld [vmem:[%s6667_s5 + $0x1d0] sm:$0xff] }
  0x44   :  { %4578 = vmatmul.mubr.f32.vlgmr.msra.gmra.mrb[2].mxu0 %v5858_v30  ;;  %5196 = vmatprep.subr.bf16.mxu1 %v5195_v35  ;;  %v215_v20 = vld [vmem:[%s6668_s6 + $0x128] sm:$0xff]  ;;  %v173_v23 = vld [vmem:[%s6667_s5 + $0x1d8] sm:$0xff]  ;;  %v216_v25 = vld [vmem:[%s6668_s6 + $0x130] sm:$0xff] }
  0x45   :  { %5214 = vmatpush3.bf16.msra.mxu0 %v5211_v24  ;;  %4647 = vmatprep.mubr.f32.mxu0 %v5863_v32  ;;  %v5283_v24 = vpack.c.bf16 %v215_v20, %v214_v19  ;;  %v217_v26 = vld [vmem:[%s6668_s6 + $0x138] sm:$0xff]  ;;  %v5263_v27 = vpack.c.bf16 %v173_v23, %v172_v22  ;;  %v174_v28 = vld [vmem:[%s6667_s5 + $0x1e0] sm:$0xff]  ;;  %v175_v29 = vld [vmem:[%s6667_s5 + $0x1e8] sm:$0xff] }
  0x46   :  { %5216 = vmatprep.subr.bf16.mxu0 %v5215_v31  ;;  %v5267_v33 = vpack.c.bf16 %v175_v29, %v174_v28  ;;  %v176_v34 = vld [vmem:[%s6667_s5 + $0x1f0] sm:$0xff]  ;;  %v226_v40 = vld [vmem:[%s6668_s6 + $0x180] sm:$0xff]  ;;  %v49_v2 = vld [vmem:[%s6664_s2 + $0x18] sm:$0xff] }
  0x47   :  { %5198 = vmatpush3.bf16.msra.mxu1 %v5195_v35  ;;  %v177_v35 = vld [vmem:[%s6667_s5 + $0x1f8] sm:$0xff]  ;;  %v220_v37 = vld [vmem:[%s6668_s6 + $0x150] sm:$0xff]  ;;  %v222_v43 = vld [vmem:[%s6668_s6 + $0x160] sm:$0xff] }
  0x48   :  { %5200 = vmatprep.subr.bf16.mxu1 %v5199_v41  ;;  %v5271_v39 = vpack.c.bf16 %v177_v35, %v176_v34  ;;  %v228_v46 = vld [vmem:[%s6668_s6 + $0x190] sm:$0xff]  ;;  %v230_v52 = vld [vmem:[%s6668_s6 + $0x1a0] sm:$0xff]  ;;  %v55_v6 = vld [vmem:[%s6666_s4 + $0x28] sm:$0xff] }
  0x49   :  { %5218 = vmatpush3.bf16.msra.mxu0 %v5215_v31  ;;  %v218_v31 = vld [vmem:[%s6668_s6 + $0x140] sm:$0xff]  ;;  %v224_v49 = vld [vmem:[%s6668_s6 + $0x170] sm:$0xff]  ;;  %v237_v9 = vld [vmem:[%s6668_s6 + $0x1d8] sm:$0xff] }
  0x4a   :  { %5220 = vmatprep.subr.bf16.mxu0 %v5219_v38  ;;  %v50_v55 = vld [vmem:[%s6666_s4] sm:$0xff]  ;;  %v232_v58 = vld [vmem:[%s6668_s6 + $0x1b0] sm:$0xff]  ;;  %v57_v12 = vld [vmem:[%s6666_s4 + $0x38] sm:$0xff] }
  0x4b   :  { %5202 = vmatpush3.bf16.msra.mxu1 %v5199_v41  ;;  %v227_v41 = vld [vmem:[%s6668_s6 + $0x188] sm:$0xff]  ;;  %v52_v61 = vld [vmem:[%s6666_s4 + $0x10] sm:$0xff]  ;;  %v234_v0 = vld [vmem:[%s6668_s6 + $0x1c0] sm:$0xff] }
  0x4c   :  { %5204 = vmatprep.subr.bf16.mxu1 %v5203_v47  ;;  %v5307_v45 = vpack.c.bf16 %v227_v41, %v226_v40  ;;  %v54_v5 = vld [vmem:[%s6666_s4 + $0x20] sm:$0xff]  ;;  %v236_v8 = vld [vmem:[%s6668_s6 + $0x1d0] sm:$0xff]  ;;  %v239_v15 = vld [vmem:[%s6668_s6 + $0x1e8] sm:$0xff] }
  0x4d   :  { %5222 = vmatpush3.bf16.msra.mxu0 %v5219_v38  ;;  %v221_v38 = vld [vmem:[%s6668_s6 + $0x158] sm:$0xff]  ;;  %v56_v11 = vld [vmem:[%s6666_s4 + $0x30] sm:$0xff]  ;;  %v238_v14 = vld [vmem:[%s6668_s6 + $0x1e0] sm:$0xff] }
  0x4e   :  { %5224 = vmatprep.subr.bf16.mxu0 %v5223_v44  ;;  %v5295_v42 = vpack.c.bf16 %v221_v38, %v220_v37  ;;  %v5331_v19 = vpack.c.bf16 %v239_v15, %v238_v14  ;;  %v240_v20 = vld [vmem:[%s6668_s6 + $0x1f0] sm:$0xff]  ;;  %v63_v28 = vld [vmem:[%s6666_s4 + $0x68] sm:$0xff]  ;;  %v253_v14 = vld [vmem:[%s6665_s3 + $0x2] sm:$0x3]  ;;  %v5593_v15 = vmov 0  }
  0x4f   :  { %5206 = vmatpush3.bf16.msra.mxu1 %v5203_v47  ;;  %v229_v47 = vld [vmem:[%s6668_s6 + $0x198] sm:$0xff]  ;;  %v60_v23 = vld [vmem:[%s6666_s4 + $0x50] sm:$0xff]  ;;  %vm255_vm3 = vnez %v253_v14 }
  0x50   :  { %5208 = vmatprep.subr.bf16.mxu1 %v5207_v53  ;;  %v5311_v51 = vpack.c.bf16 %v229_v47, %v228_v46  ;;  %v6139_v34 = vld [vmem:[%s6662_s0 + $0x10] sm:$0xff] }
  0x51   :  { %5226 = vmatpush3.bf16.msra.mxu0 %v5223_v44  ;;  %v223_v44 = vld [vmem:[%s6668_s6 + $0x168] sm:$0xff] }
  0x52   :  { %5228 = vmatprep.subr.bf16.mxu0 %v5227_v50  ;;  %v5299_v48 = vpack.c.bf16 %v223_v44, %v222_v43 }
  0x53   :  { %5210 = vmatpush3.bf16.msra.mxu1 %v5207_v53  ;;  %v231_v53 = vld [vmem:[%s6668_s6 + $0x1a8] sm:$0xff] }
  0x54   :  { %5244 = vmatprep.subr.bf16.mxu1 %v5243_v59  ;;  %v5315_v57 = vpack.c.bf16 %v231_v53, %v230_v52  ;;  %v66_v53 = vld [vmem:[%s6666_s4 + $0x80] sm:$0xff] }
  0x55   :  { %5230 = vmatpush3.bf16.msra.mxu0 %v5227_v50  ;;  %v225_v50 = vld [vmem:[%s6668_s6 + $0x178] sm:$0xff] }
  0x56   :  { %5232 = vmatprep.subr.bf16.mxu0 %v5231_v56  ;;  %4613 = vmatmul.mubr.f32.vlgmr.msra.gmra.mrb[2].mxu1 %v5858_v30  ;;  %v5287_v30 = vpack.c.bf16 %v217_v26, %v216_v25  ;;  %v5303_v54 = vpack.c.bf16 %v225_v50, %v224_v49 }
  0x57   :  { %5246 = vmatpush3.bf16.msra.mxu1 %v5243_v59  ;;  %4682 = vmatprep.mubr.f32.mxu1 %v5863_v32  ;;  %v219_v32 = vld [vmem:[%s6668_s6 + $0x148] sm:$0xff]  ;;  %v233_v59 = vld [vmem:[%s6668_s6 + $0x1b8] sm:$0xff] }
  0x58   :  { %5248 = vmatprep.subr.bf16.mxu1 %v5247_v1  ;;  %v5291_v36 = vpack.c.bf16 %v219_v32, %v218_v31  ;;  %v5319_v63 = vpack.c.bf16 %v233_v59, %v232_v58  ;;  %v65_v31 = vld [vmem:[%s6666_s4 + $0x78] sm:$0xff]  ;;  %v5591_v32 = vmov 0.0   ;;  %v70_v59 = vld [vmem:[%s6666_s4 + $0xa0] sm:$0xff] }
  0x59   :  { %5234 = vmatpush3.bf16.msra.mxu0 %v5231_v56  ;;  %v51_v56 = vld [vmem:[%s6666_s4 + $0x8] sm:$0xff] }
  0x5a   :  { %5236 = vmatprep.subr.bf16.mxu0 %v5235_v62  ;;  %v5339_v60 = vpack.c.bf16 %v51_v56, %v50_v55  ;;  %v68_v55 = vld [vmem:[%s6666_s4 + $0x90] sm:$0xff] }
  0x5b   :  { %5250 = vmatpush3.bf16.msra.mxu1 %v5247_v1  ;;  %v235_v1 = vld [vmem:[%s6668_s6 + $0x1c8] sm:$0xff] }
  0x5c   :  { %5252 = vmatprep.subr.bf16.mxu1 %v5251_v7 }
  0x5d   :  { %5238 = vmatpush3.bf16.msra.mxu0 %v5235_v62  ;;  %v53_v62 = vld [vmem:[%s6666_s4 + $0x18] sm:$0xff] }
  0x5e   :  { %5240 = vmatprep.subr.bf16.mxu0 %v5239_v4  ;;  %v5343_v3 = vpack.c.bf16 %v53_v62, %v52_v61  ;;  %v72_v62 = vld [vmem:[%s6666_s4 + $0xb0] sm:$0xff] }
  0x5f   :  { %5254 = vmatpush3.bf16.msra.mxu1 %v5251_v7  ;;  %v5323_v7 = vpack.c.bf16 %v235_v1, %v234_v0  ;;  %v74_v1 = vld [vmem:[%s6666_s4 + $0xc0] sm:$0xff] }
  0x60   :  { %5256 = vmatprep.subr.bf16.mxu1 %v5255_v13 }
  0x61   :  { %5242 = vmatpush3.bf16.msra.mxu0 %v5239_v4  ;;  %v38_v4 = vld [vmem:[%s6662_s0] sm:$0xff] }
  0x62   :  { %5276 = vmatprep.subr.bf16.mxu0 %v5275_v10 }
  0x63   :  { %5258 = vmatpush3.bf16.msra.mxu1 %v5255_v13  ;;  %v5327_v13 = vpack.c.bf16 %v237_v9, %v236_v8  ;;  %v79_v8 = vld [vmem:[%s6666_s4 + $0xe8] sm:$0xff] }
  0x64   :  { %4648 = vmatmul.mubr.f32.vlgmr.msra.gmra.mrb[4].mxu0 %v5968_v16  ;;  %5260 = vmatprep.subr.bf16.mxu1 %v5259_v21 }
  0x65   :  { %5278 = vmatpush3.bf16.msra.mxu0 %v5275_v10  ;;  %4717 = vmatprep.mubr.f32.mxu0 %v5973_v18  ;;  %v5347_v10 = vpack.c.bf16 %v55_v6, %v54_v5  ;;  %v77_v5 = vld [vmem:[%s6666_s4 + $0xd8] sm:$0xff] }
  0x66   :  { %5280 = vmatprep.subr.bf16.mxu0 %v5279_v17 }
  0x67   :  { %5262 = vmatpush3.bf16.msra.mxu1 %v5259_v21  ;;  %v241_v21 = vld [vmem:[%s6668_s6 + $0x1f8] sm:$0xff] }
  0x68   :  { %5264 = vmatprep.subr.bf16.mxu1 %v5263_v27  ;;  %v5335_v25 = vpack.c.bf16 %v241_v21, %v240_v20 }
  0x69   :  { %5282 = vmatpush3.bf16.msra.mxu0 %v5279_v17  ;;  %v58_v17 = vld [vmem:[%s6666_s4 + $0x40] sm:$0xff] }
  0x6a   :  { %5284 = vmatprep.subr.bf16.mxu0 %v5283_v24 }
  0x6b   :  { %5266 = vmatpush3.bf16.msra.mxu1 %v5263_v27  ;;  %v62_v27 = vld [vmem:[%s6666_s4 + $0x60] sm:$0xff] }
  0x6c   :  { %5268 = vmatprep.subr.bf16.mxu1 %v5267_v33  ;;  %v5363_v29 = vpack.c.bf16 %v63_v28, %v62_v27 }
  0x6d   :  { %5286 = vmatpush3.bf16.msra.mxu0 %v5283_v24  ;;  %v61_v24 = vld [vmem:[%s6666_s4 + $0x58] sm:$0xff] }
  0x6e   :  { %5288 = vmatprep.subr.bf16.mxu0 %v5287_v30  ;;  %v5359_v26 = vpack.c.bf16 %v61_v24, %v60_v23 }
  0x6f   :  { %5270 = vmatpush3.bf16.msra.mxu1 %v5267_v33 }
  0x70   :  { %5272 = vmatprep.subr.bf16.mxu1 %v5271_v39 }
  0x71   :  { %5290 = vmatpush3.bf16.msra.mxu0 %v5287_v30  ;;  %v64_v30 = vld [vmem:[%s6666_s4 + $0x70] sm:$0xff] }
  0x72   :  { %5292 = vmatprep.subr.bf16.mxu0 %v5291_v36  ;;  %v5367_v33 = vpack.c.bf16 %v65_v31, %v64_v30 }
  0x73   :  { %5274 = vmatpush3.bf16.msra.mxu1 %v5271_v39 }
  0x74   :  { %5308 = vmatprep.subr.bf16.mxu1 %v5307_v45 }
  0x75   :  { %5294 = vmatpush3.bf16.msra.mxu0 %v5291_v36 }
  0x76   :  { %5296 = vmatprep.subr.bf16.mxu0 %v5295_v42  ;;  %4683 = vmatmul.mubr.f32.vlgmr.msra.gmra.mrb[4].mxu1 %v5968_v16  ;;  %v5351_v16 = vpack.c.bf16 %v57_v12, %v56_v11  ;;  %v81_v11 = vld [vmem:[%s6666_s4 + $0xf8] sm:$0xff] }
  0x77   :  { %5310 = vmatpush3.bf16.msra.mxu1 %v5307_v45  ;;  %4752 = vmatprep.mubr.f32.mxu1 %v5973_v18  ;;  %v59_v18 = vld [vmem:[%s6666_s4 + $0x48] sm:$0xff] }
  0x78   :  { %5312 = vmatprep.subr.bf16.mxu1 %v5311_v51  ;;  %v5355_v22 = vpack.c.bf16 %v59_v18, %v58_v17  ;;  %v1085_v18 = vsel %vm255_vm3, 16843009, %v5593_v15 }
  0x79   :  { %5298 = vmatpush3.bf16.msra.mxu0 %v5295_v42  ;;  %v1087_v20 = vunpack.c.0.s8 %v1085_v18 }
  0x7a   :  { %5300 = vmatprep.subr.bf16.mxu0 %v5299_v48 }
  0x7b   :  { %5314 = vmatpush3.bf16.msra.mxu1 %v5311_v51  ;;  %vm6264_vm6 = vcmp.ne.s32.totalorder %v1087_v20, 0 }
  0x7c   :  { %5316 = vmatprep.subr.bf16.mxu1 %v5315_v57 }
  0x7d   :  { %5302 = vmatpush3.bf16.msra.mxu0 %v5299_v48 }
  0x7e   :  { %5304 = vmatprep.subr.bf16.mxu0 %v5303_v54 }
  0x7f   :  { %5318 = vmatpush3.bf16.msra.mxu1 %v5315_v57  ;;  %v69_v57 = vld [vmem:[%s6666_s4 + $0x98] sm:$0xff] }
  0x80   :  { %5320 = vmatprep.subr.bf16.mxu1 %v5319_v63  ;;  %v5375_v58 = vpack.c.bf16 %v69_v57, %v68_v55 }
  0x81   :  { %5306 = vmatpush3.bf16.msra.mxu0 %v5303_v54  ;;  %v67_v54 = vld [vmem:[%s6666_s4 + $0x88] sm:$0xff] }
  0x82   :  { %5340 = vmatprep.subr.bf16.mxu0 %v5339_v60  ;;  %v5371_v56 = vpack.c.bf16 %v67_v54, %v66_v53 }
  0x83   :  { %5322 = vmatpush3.bf16.msra.mxu1 %v5319_v63  ;;  %v73_v63 = vld [vmem:[%s6666_s4 + $0xb8] sm:$0xff] }
  0x84   :  { %4718 = vmatmul.mubr.f32.vlgmr.msra.gmra.mrb[6].mxu0 %v49_v2  ;;  %5324 = vmatprep.subr.bf16.mxu1 %v5323_v7  ;;  %v5383_v0 = vpack.c.bf16 %v73_v63, %v72_v62 }
  0x85   :  { %5342 = vmatpush3.bf16.msra.mxu0 %v5339_v60  ;;  %4787 = vmatprep.mubr.f32.mxu0 %v38_v4  ;;  %v71_v60 = vld [vmem:[%s6666_s4 + $0xa8] sm:$0xff] }
  0x86   :  { %5344 = vmatprep.subr.bf16.mxu0 %v5343_v3  ;;  %v5379_v61 = vpack.c.bf16 %v71_v60, %v70_v59 }
  0x87   :  { %5326 = vmatpush3.bf16.msra.mxu1 %v5323_v7  ;;  %v78_v7 = vld [vmem:[%s6666_s4 + $0xe0] sm:$0xff] }
  0x88   :  { %5328 = vmatprep.subr.bf16.mxu1 %v5327_v13  ;;  %v5395_v9 = vpack.c.bf16 %v79_v8, %v78_v7 }
  0x89   :  { %5346 = vmatpush3.bf16.msra.mxu0 %v5343_v3 }
  0x8a   :  { %5348 = vmatprep.subr.bf16.mxu0 %v5347_v10 }
  0x8b   :  { %5330 = vmatpush3.bf16.msra.mxu1 %v5327_v13  ;;  %v252_v13 = vld [vmem:[%s6665_s3] sm:$0x3] }
  0x8c   :  { %5332 = vmatprep.subr.bf16.mxu1 %v5331_v19  ;;  %vm254_vm2 = vnez %v252_v13 }
  0x8d   :  { %5350 = vmatpush3.bf16.msra.mxu0 %v5347_v10  ;;  %v80_v10 = vld [vmem:[%s6666_s4 + $0xf0] sm:$0xff] }
  0x8e   :  { %5352 = vmatprep.subr.bf16.mxu0 %v5351_v16  ;;  %v5399_v12 = vpack.c.bf16 %v81_v11, %v80_v10 }
  0x8f   :  { %5334 = vmatpush3.bf16.msra.mxu1 %v5331_v19 }
  0x90   :  { %5336 = vmatprep.subr.bf16.mxu1 %v5335_v25 }
  0x91   :  { %5354 = vmatpush3.bf16.msra.mxu0 %v5351_v16  ;;  %v1084_v16 = vsel %vm254_vm2, 16843009, %v5593_v15 }
  0x92   :  { %5356 = vmatprep.subr.bf16.mxu0 %v5355_v22  ;;  %v1086_v17 = vunpack.c.0.s8 %v1084_v16 }
  0x93   :  { %5338 = vmatpush3.bf16.msra.mxu1 %v5335_v25 }
  0x94   :  { %4790 = vmatprep.subr.mxu1 %v5591_v32  ;;  %vm6257_vm4 = vcmp.ne.s32.totalorder %v1086_v17, 0 }
  0x95   :  { %5358 = vmatpush3.bf16.msra.mxu0 %v5355_v22 }
  0x96   :  { %5360 = vmatprep.subr.bf16.mxu0 %v5359_v26  ;;  %4753 = vmatmul.mubr.f32.vlgmr.msra.gmra.mrb[6].mxu1 %v49_v2  ;;  %v75_v2 = vld [vmem:[%s6666_s4 + $0xc8] sm:$0xff] }
  0x97   :  { %4792 = vmatprep.mubr.msk.f32.mxu1 %vm5592_vm1, %v5591_v32  ;;  %v5387_v3 = vpack.c.bf16 %v75_v2, %v74_v1 }
  0x99   :  { %5362 = vmatpush3.bf16.msra.mxu0 %v5359_v26 }
  0x9a   :  { %5364 = vmatprep.subr.bf16.mxu0 %v5363_v29 }
  0x9d   :  { %5366 = vmatpush3.bf16.msra.mxu0 %v5363_v29 }
  0x9e   :  { %5368 = vmatprep.subr.bf16.mxu0 %v5367_v33 }
  0xa1   :  { %5370 = vmatpush3.bf16.msra.mxu0 %v5367_v33 }
  0xa2   :  { %5372 = vmatprep.subr.bf16.mxu0 %v5371_v56 }
  0xa4   :  { %4788 = vmatmul.mubr.f32.vlgmr.msra.gmra.mrb[8].mxu0 %v6139_v34 }
  0xa5   :  { %4862 = vmatprep.mubr.f32.mxu0 %v38_v4  ;;  %5374 = vmatpush3.bf16.msra.mxu0 %v5371_v56  ;;  %v76_v4 = vld [vmem:[%s6666_s4 + $0xd0] sm:$0xff] }
  0xa6   :  { %5376 = vmatprep.subr.bf16.mxu0 %v5375_v58  ;;  %v5391_v6 = vpack.c.bf16 %v77_v5, %v76_v4 }
  0xa9   :  { %5378 = vmatpush3.bf16.msra.mxu0 %v5375_v58 }
  0xaa   :  { %5380 = vmatprep.subr.bf16.mxu0 %v5379_v61 }
  0xad   :  { %5382 = vmatpush3.bf16.msra.mxu0 %v5379_v61 }
  0xae   :  { %5384 = vmatprep.subr.bf16.mxu0 %v5383_v0 }
  0xb1   :  { %5386 = vmatpush3.bf16.msra.mxu0 %v5383_v0 }
  0xb2   :  { %5388 = vmatprep.subr.bf16.mxu0 %v5387_v3 }
  0xb5   :  { %5390 = vmatpush3.bf16.msra.mxu0 %v5387_v3 }
  0xb6   :  { %5392 = vmatprep.subr.bf16.mxu0 %v5391_v6 }
  0xb9   :  { %5394 = vmatpush3.bf16.msra.mxu0 %v5391_v6 }
  0xba   :  { %5396 = vmatprep.subr.bf16.mxu0 %v5395_v9 }
  0xbd   :  { %5398 = vmatpush3.bf16.msra.mxu0 %v5395_v9 }
  0xbe   :  { %5400 = vmatprep.subr.bf16.mxu0 %v5399_v12 }
  0xc1   :  { %5402 = vmatpush3.bf16.msra.mxu0 %v5399_v12 }
  0xc4   :  { %4863 = vmatmul.mubr.f32.vlgmr.msra.gmra.mrb[10].mxu0 %v6139_v34 }
  0xf7   :  { %v6142_v35 = vpop.f32.mrb[0].mxu0 }
  0xf8   :  { %v6144_v36 = vpop.f32.mrb[1].mxu0 }
  0xf9   :  { %4791 = vmatpush3.xpose.msk.msra.mxu1 %vm931_vm0, %v6144_v36 }
  0xfa   :  { %4795 = vmatprep.subr.mxu1 %v5591_v32 }
 0x109   :  { %v6151_v37 = vpop.f32.mrb[0].mxu1 }
 0x10a   :  { %v6153_v38 = vpop.f32.mrb[1].mxu1 }
 0x117   :  { %v6155_v39 = vpop.f32.mrb[2].mxu0 }
 0x118   :  { %v6157_v40 = vpop.f32.mrb[3].mxu0 }
 0x129   :  { %v6159_v41 = vpop.f32.mrb[2].mxu1 }
 0x12a   :  { %v6161_v42 = vpop.f32.mrb[3].mxu1 }
 0x137   :  { %v6163_v43 = vpop.f32.mrb[4].mxu0 }
 0x138   :  { %v6165_v44 = vpop.f32.mrb[5].mxu0 }
 0x149   :  { %v6167_v45 = vpop.f32.mrb[4].mxu1 }
 0x14a   :  { %v6169_v46 = vpop.f32.mrb[5].mxu1 }
 0x157   :  { %v6171_v47 = vpop.f32.mrb[6].mxu0 }
 0x158   :  { %v6173_v48 = vpop.f32.mrb[7].mxu0 }
 0x169   :  { %v6175_v49 = vpop.f32.mrb[6].mxu1 }
 0x16a   :  { %v6177_v50 = vpop.f32.mrb[7].mxu1 }
 0x177   :  { %v4789_v51 = vpop.f32.mrb[8].mxu0 }
 0x178   :  { %v922_v52 = vpop.f32.mrb[9].mxu0 }
 0x179   :  { %4793 = vmatmul.mubr.msk.f32.vlgmr.msra.gmra.mrb[8].mxu1 %vm931_vm0, %v922_v52 }
 0x17a   :  { %4796 = vmatpush3.xpose.msk.msra.mxu1 %vm931_vm0, %v6142_v35  ;;  %4797 = vmatprep.mubr.msk.f32.mxu1 %vm5592_vm1, %v5591_v32 }
 0x17b   :  { %4800 = vmatprep.subr.mxu1 %v5591_v32 }
 0x17d   :  { %4798 = vmatmul.mubr.msk.f32.vlgmr.msra.gmra.mrb[10].mxu1 %vm931_vm0, %v4789_v51 }
 0x17e   :  { %4801 = vmatpush3.xpose.msk.msra.mxu1 %vm931_vm0, %v6165_v44  ;;  %4802 = vmatprep.mubr.msk.f32.mxu1 %vm5592_vm1, %v5591_v32 }
 0x17f   :  { %4805 = vmatprep.subr.mxu1 %v5591_v32 }
 0x181   :  { %4803 = vmatmul.mubr.msk.f32.vlgmr.msra.gmra.mrb[12].mxu1 %vm931_vm0, %v922_v52 }
 0x182   :  { %4806 = vmatpush3.xpose.msk.msra.mxu1 %vm931_vm0, %v6163_v43  ;;  %4807 = vmatprep.mubr.msk.f32.mxu1 %vm5592_vm1, %v5591_v32 }
 0x183   :  { %4810 = vmatprep.subr.mxu1 %v5591_v32 }
 0x185   :  { %4808 = vmatmul.mubr.msk.f32.vlgmr.msra.gmra.mrb[14].mxu1 %vm931_vm0, %v4789_v51 }
 0x186   :  { %4811 = vmatpush3.msra.mxu1 %v6173_v48  ;;  %4812 = vmatprep.mubr.msk.f32.mxu1 %vm5592_vm1, %v5591_v32 }
 0x187   :  { %4815 = vmatprep.subr.mxu1 %v5591_v32 }
 0x197   :  { %v4864_v13 = vpop.f32.mrb[10].mxu0 }
 0x198   :  { %v1647_v14 = vpop.f32.mrb[11].mxu0 }
 0x24c   :  { %v1004_v21 = vpop.f32.mrb[8].mxu1 }
 0x24d   :  { %v1090_v22 = vsel %vm6257_vm4, %v1004_v21, -1e+09  ;;  %v4794_v23 = vpop.f32.mrb[9].mxu1 }
 0x24e   :  { %v1241_v24 = vsel %vm1240_vm5, %v1090_v22, -inf }
 0x24f   :  { %1242 = vmax.xlane.f32.xlu0 %v1241_v24 }
 0x250   :  { %v1080_v26 = vpop.f32.mrb[10].mxu1 }
 0x251   :  { %v1091_v27 = vsel %vm6264_vm6, %v1080_v26, -1e+09  ;;  %v4799_v28 = vpop.f32.mrb[11].mxu1 }
 0x252   :  { %v1244_v29 = vsel %vm1240_vm5, %v1091_v27, -inf }
 0x253   :  { %1245 = vmax.xlane.f32.xlu1 %v1244_v29 }
 0x254   :  { %v1161_v30 = vpop.f32.mrb[12].mxu1 }
 0x255   :  { %v1238_v31 = vsel %vm6257_vm4, %v1161_v30, -1e+09  ;;  %v4804_v33 = vpop.f32.mrb[13].mxu1 }
 0x256   :  { %v1247_v34 = vsel %vm1240_vm5, %v1238_v31, -inf }
 0x257   :  { %1248 = vmax.xlane.f32.xlu0 %v1247_v34 }
 0x258   :  { %v1234_v51 = vpop.f32.mrb[14].mxu1 }
 0x259   :  { %v1239_v52 = vsel %vm6264_vm6, %v1234_v51, -1e+09  ;;  %v4809_v53 = vpop.f32.mrb[15].mxu1 }
 0x25a   :  { %v1250_v54 = vsel %vm1240_vm5, %v1239_v52, -inf }
 0x25b   :  { %1251 = vmax.xlane.f32.xlu1 %v1250_v54 }
 0x2dc   :  { %v1243_v55 = vpop.xlane.xlu0 %1242 }
 0x2e0   :  { %v1246_v56 = vpop.xlane.xlu1 %1245 }
 0x2e4   :  { %v1249_v57 = vpop.xlane.xlu0 %1248 }
 0x2e5   :  { %v1253_v58 = vmax.f32 %v1243_v55, %v1249_v57 }
 0x2e7   :  { %v1255_v59 = vsub.f32 %v1090_v22, %v1253_v58  ;;  %v1261_v60 = vsub.f32 %v1238_v31, %v1253_v58 }
 0x2e8   :  { %v1252_v61 = vpop.xlane.xlu1 %1251 }
 0x2e9   :  { %v1257_v62 = vmul.f32 1.442695, %v1255_v59  ;;  %v1263_v63 = vmul.f32 1.442695, %v1261_v60  ;;  %v1254_v0 = vmax.f32 %v1246_v56, %v1252_v61 }
 0x2eb   :  { %5509 = vpow2.f32 %v1257_v62  ;;  %v1256_v1 = vsub.f32 %v1091_v27, %v1254_v0  ;;  %v1262_v2 = vsub.f32 %v1239_v52, %v1254_v0 }
 0x2ec   :  { %5511 = vpow2.f32 %v1263_v63 }
 0x2ed   :  { %v1259_v3 = vmul.f32 1.442695, %v1256_v1  ;;  %v1265_v4 = vmul.f32 1.442695, %v1262_v2 }
 0x2ef   :  { %5513 = vpow2.f32 %v1259_v3 }
 0x2f0   :  { %5515 = vpow2.f32 %v1265_v4 }
 0x2f5   :  { %v5510_v5 = vpop.eup %5509 }
 0x2f6   :  { %v5512_v6 = vpop.eup %5511  ;;  %v1267_v7 = vsel %vm1240_vm5, %v5510_v5, 0.0 }
 0x2f7   :  { %1268 = vadd.xlane.f32.xlu0 %v1267_v7  ;;  %v1273_v8 = vsel %vm1240_vm5, %v5512_v6, 0.0 }
 0x2f8   :  { %1274 = vadd.xlane.f32.xlu1 %v1273_v8 }
 0x2f9   :  { %v5514_v9 = vpop.eup %5513 }
 0x2fa   :  { %v5516_v10 = vpop.eup %5515  ;;  %v1270_v11 = vsel %vm1240_vm5, %v5514_v9, 0.0 }
 0x2fb   :  { %v1276_v12 = vsel %vm1240_vm5, %v5516_v10, 0.0  ;;  %1271 = vadd.xlane.f32.xlu0 %v1270_v11 }
 0x2fc   :  { %1277 = vadd.xlane.f32.xlu1 %v1276_v12 }
 0x384   :  { %v1269_v15 = vpop.xlane.xlu0 %1268 }
 0x385   :  { %v1275_v16 = vpop.xlane.xlu1 %1274 }
 0x386   :  { %v1279_v17 = vadd.f32 %v1275_v16, %v1269_v15 }
 0x388   :  { %5517 = vrcp.f32 %v1279_v17  ;;  %v1272_v18 = vpop.xlane.xlu0 %1271 }
 0x389   :  { %v1278_v20 = vpop.xlane.xlu1 %1277 }
 0x38a   :  { %v1280_v21 = vadd.f32 %v1278_v20, %v1272_v18 }
 0x38c   :  { %5519 = vrcp.f32 %v1280_v21 }
 0x392   :  { %v5518_v22 = vpop.eup %5517 }
 0x393   :  { %v1287_v23 = vmul.f32 %v5518_v22, %v5512_v6  ;;  %v1285_v27 = vmul.f32 %v5518_v22, %v5510_v5 }
 0x395   :  { %4813 = vmatmul.mubr.msk.f32.vlgmr.msra.gmra.mrb[16].mxu1 %vm1240_vm5, %v1287_v23 }
 0x396   :  { %v5520_v24 = vpop.eup %5519  ;;  %4816 = vmatpush3.msra.mxu1 %v6171_v47  ;;  %4817 = vmatprep.mubr.msk.f32.mxu1 %vm5592_vm1, %v5591_v32 }
 0x397   :  { %4820 = vmatprep.subr.mxu1 %v5591_v32  ;;  %v1288_v26 = vmul.f32 %v5520_v24, %v5516_v10  ;;  %v1286_v28 = vmul.f32 %v5520_v24, %v5514_v9 }
 0x399   :  { %4818 = vmatmul.mubr.msk.f32.vlgmr.msra.gmra.mrb[18].mxu1 %vm1240_vm5, %v1288_v26 }
 0x39a   :  { %4821 = vmatpush3.msra.mxu1 %v6157_v40  ;;  %4822 = vmatprep.mubr.msk.f32.mxu1 %vm5592_vm1, %v5591_v32 }
 0x39b   :  { %4825 = vmatprep.subr.mxu1 %v5591_v32 }
 0x39d   :  { %4823 = vmatmul.mubr.msk.f32.vlgmr.msra.gmra.mrb[16].mxu1 %vm1240_vm5, %v1285_v27 }
 0x39e   :  { %4826 = vmatpush3.msra.mxu1 %v6155_v39  ;;  %4827 = vmatprep.mubr.msk.f32.mxu1 %vm5592_vm1, %v5591_v32 }
 0x39f   :  { %4865 = vmatprep.subr.mxu1 %v5591_v32 }
 0x3a1   :  { %4828 = vmatmul.mubr.msk.f32.vlgmr.msra.gmra.mrb[18].mxu1 %vm1240_vm5, %v1286_v28 }
 0x3a2   :  { %4867 = vmatprep.mubr.msk.f32.mxu1 %vm5592_vm1, %v5591_v32 }
 0x3a5   :  { %4866 = vmatpush3.xpose.msk.msra.mxu1 %vm931_vm0, %v6153_v38 }
 0x3a6   :  { %4870 = vmatprep.subr.mxu1 %v5591_v32 }
 0x3a8   :  { %4868 = vmatmul.mubr.msk.f32.vlgmr.msra.gmra.mrb[20].mxu1 %vm931_vm0, %v1647_v14 }
 0x3a9   :  { %4871 = vmatpush3.xpose.msk.msra.mxu1 %vm931_vm0, %v6151_v37  ;;  %4872 = vmatprep.mubr.msk.f32.mxu1 %vm5592_vm1, %v5591_v32 }
 0x3aa   :  { %4875 = vmatprep.subr.mxu1 %v5591_v32 }
 0x3ac   :  { %4873 = vmatmul.mubr.msk.f32.vlgmr.msra.gmra.mrb[22].mxu1 %vm931_vm0, %v4864_v13 }
 0x3ad   :  { %4876 = vmatpush3.xpose.msk.msra.mxu1 %vm931_vm0, %v6169_v46  ;;  %4877 = vmatprep.mubr.msk.f32.mxu1 %vm5592_vm1, %v5591_v32 }
 0x3ae   :  { %4880 = vmatprep.subr.mxu1 %v5591_v32 }
 0x3b0   :  { %4878 = vmatmul.mubr.msk.f32.vlgmr.msra.gmra.mrb[24].mxu1 %vm931_vm0, %v1647_v14 }
 0x3b1   :  { %4881 = vmatpush3.xpose.msk.msra.mxu1 %vm931_vm0, %v6167_v45  ;;  %4882 = vmatprep.mubr.msk.f32.mxu1 %vm5592_vm1, %v5591_v32 }
 0x3b2   :  { %4885 = vmatprep.subr.mxu1 %v5591_v32 }
 0x3b4   :  { %4883 = vmatmul.mubr.msk.f32.vlgmr.msra.gmra.mrb[26].mxu1 %vm931_vm0, %v4864_v13 }
 0x3b5   :  { %4886 = vmatpush3.msra.mxu1 %v6177_v50  ;;  %4887 = vmatprep.mubr.msk.f32.mxu1 %vm5592_vm1, %v5591_v32 }
 0x3b6   :  { %4890 = vmatprep.subr.mxu1 %v5591_v32 }
 0x470   :  { %v6325_v29 = vpop.f32.mrb[16].mxu1 }
 0x471   :  { %v4824_v30 = vpop.f32.mrb[17].mxu1 }
 0x474   :  { %v6327_v31 = vpop.f32.mrb[18].mxu1 }
 0x475   :  { %v4829_v33 = vpop.f32.mrb[19].mxu1 }
 0x47b   :  { %v1728_v34 = vpop.f32.mrb[20].mxu1 }
 0x47c   :  { %v1808_v51 = vsel %vm6257_vm4, %v1728_v34, -1e+09  ;;  %v4869_v52 = vpop.f32.mrb[21].mxu1 }
 0x47d   :  { %v1958_v53 = vsel %vm1240_vm5, %v1808_v51, -inf }
 0x47e   :  { %1959 = vmax.xlane.f32.xlu0 %v1958_v53 }
 0x47f   :  { %v1804_v54 = vpop.f32.mrb[22].mxu1 }
 0x480   :  { %v1809_v55 = vsel %vm6264_vm6, %v1804_v54, -1e+09  ;;  %v4874_v56 = vpop.f32.mrb[23].mxu1 }
 0x481   :  { %v1961_v57 = vsel %vm1240_vm5, %v1809_v55, -inf  ;;  %v83_v56 = vld [vmem:[%s6666_s4 + $0x108] sm:$0xff] }
 0x482   :  { %1962 = vmax.xlane.f32.xlu0 %v1961_v57 }
 0x483   :  { %v1879_v58 = vpop.f32.mrb[24].mxu1 }
 0x484   :  { %v1956_v59 = vsel %vm6257_vm4, %v1879_v58, -1e+09  ;;  %v4879_v60 = vpop.f32.mrb[25].mxu1 }
 0x485   :  { %v1964_v61 = vsel %vm1240_vm5, %v1956_v59, -inf  ;;  %v85_v60 = vld [vmem:[%s6666_s4 + $0x118] sm:$0xff] }
 0x486   :  { %1965 = vmax.xlane.f32.xlu1 %v1964_v61 }
 0x487   :  { %v1952_v62 = vpop.f32.mrb[26].mxu1 }
 0x488   :  { %v1957_v63 = vsel %vm6264_vm6, %v1952_v62, -1e+09  ;;  %v4884_v0 = vpop.f32.mrb[27].mxu1 }
 0x489   :  { %v1967_v1 = vsel %vm1240_vm5, %v1957_v63, -inf  ;;  %v86_v0 = vld [vmem:[%s6666_s4 + $0x120] sm:$0xff] }
 0x48a   :  { %1968 = vmax.xlane.f32.xlu1 %v1967_v1  ;;  %v87_v1 = vld [vmem:[%s6666_s4 + $0x128] sm:$0xff] }
 0x50b   :  { %v1960_v2 = vpop.xlane.xlu0 %1959 }
 0x50f   :  { %v1963_v7 = vpop.xlane.xlu0 %1962 }
 0x513   :  { %v1966_v3 = vpop.xlane.xlu1 %1965 }
 0x514   :  { %v1970_v4 = vmax.f32 %v1960_v2, %v1966_v3  ;;  %v5419_v2 = vpack.c.bf16 %v87_v1, %v86_v0  ;;  %v88_v3 = vld [vmem:[%s6666_s4 + $0x130] sm:$0xff]  ;;  %v110_v0 = vld [vmem:[%s6666_s4 + $0x1e0] sm:$0xff]  ;;  %v111_v1 = vld [vmem:[%s6666_s4 + $0x1e8] sm:$0xff] }
 0x516   :  { %v1972_v5 = vsub.f32 %v1808_v51, %v1970_v4  ;;  %v1978_v6 = vsub.f32 %v1956_v59, %v1970_v4  ;;  %v84_v59 = vld [vmem:[%s6666_s4 + $0x110] sm:$0xff]  ;;  %v89_v4 = vld [vmem:[%s6666_s4 + $0x138] sm:$0xff] }
 0x517   :  { %v1969_v8 = vpop.xlane.xlu1 %1968  ;;  %v5415_v62 = vpack.c.bf16 %v85_v60, %v84_v59  ;;  %v108_v60 = vld [vmem:[%s6666_s4 + $0x1d0] sm:$0xff] }
 0x518   :  { %v1974_v9 = vmul.f32 1.442695, %v1972_v5  ;;  %v1980_v10 = vmul.f32 1.442695, %v1978_v6  ;;  %v1971_v11 = vmax.f32 %v1963_v7, %v1969_v8  ;;  %v5423_v5 = vpack.c.bf16 %v89_v4, %v88_v3  ;;  %v90_v6 = vld [vmem:[%s6666_s4 + $0x140] sm:$0xff]  ;;  %v91_v7 = vld [vmem:[%s6666_s4 + $0x148] sm:$0xff] }
 0x519   :  { %v5427_v8 = vpack.c.bf16 %v91_v7, %v90_v6  ;;  %v112_v3 = vld [vmem:[%s6666_s4 + $0x1f0] sm:$0xff]  ;;  %v113_v4 = vld [vmem:[%s6666_s4 + $0x1f8] sm:$0xff] }
 0x51a   :  { %5521 = vpow2.f32 %v1974_v9  ;;  %v1973_v12 = vsub.f32 %v1809_v55, %v1971_v11  ;;  %v1979_v13 = vsub.f32 %v1957_v63, %v1971_v11  ;;  %v82_v55 = vld [vmem:[%s6666_s4 + $0x100] sm:$0xff]  ;;  %v6374_v63 = vld [vmem:[%s6662_s0 + $0x8] sm:$0xff]  ;;  %v92_v9 = vld [vmem:[%s6666_s4 + $0x150] sm:$0xff] }
 0x51b   :  { %5523 = vpow2.f32 %v1980_v10  ;;  %v5411_v58 = vpack.c.bf16 %v83_v56, %v82_v55  ;;  %v93_v10 = vld [vmem:[%s6666_s4 + $0x158] sm:$0xff] }
 0x51c   :  { %v1976_v14 = vmul.f32 1.442695, %v1973_v12  ;;  %v1982_v15 = vmul.f32 1.442695, %v1979_v13  ;;  %v5431_v11 = vpack.c.bf16 %v93_v10, %v92_v9  ;;  %v94_v12 = vld [vmem:[%s6666_s4 + $0x160] sm:$0xff]  ;;  %v95_v13 = vld [vmem:[%s6666_s4 + $0x168] sm:$0xff] }
 0x51d   :  { %v105_v55 = vld [vmem:[%s6666_s4 + $0x1b8] sm:$0xff] }
 0x51e   :  { %5525 = vpow2.f32 %v1976_v14  ;;  %v5435_v14 = vpack.c.bf16 %v95_v13, %v94_v12 }
 0x51f   :  { %5527 = vpow2.f32 %v1982_v15  ;;  %v96_v15 = vld [vmem:[%s6666_s4 + $0x170] sm:$0xff] }
 0x524   :  { %v5522_v16 = vpop.eup %5521 }
 0x525   :  { %v5524_v17 = vpop.eup %5523  ;;  %v1984_v18 = vsel %vm1240_vm5, %v5522_v16, 0.0 }
 0x526   :  { %1985 = vadd.xlane.f32.xlu0 %v1984_v18  ;;  %v1990_v20 = vsel %vm1240_vm5, %v5524_v17, 0.0  ;;  %v6417_v18 = vld [vmem:[%s6662_s0 + $0x18] sm:$0xff] }
 0x527   :  { %1991 = vadd.xlane.f32.xlu1 %v1990_v20  ;;  %v244_v20 = vld [vmem:[%s6669_s7 + $0x10] sm:$0xff] }
 0x528   :  { %v5526_v21 = vpop.eup %5525 }
 0x529   :  { %v5528_v22 = vpop.eup %5527  ;;  %v1987_v23 = vsel %vm1240_vm5, %v5526_v21, 0.0 }
 0x52a   :  { %v1993_v24 = vsel %vm1240_vm5, %v5528_v22, 0.0  ;;  %1988 = vadd.xlane.f32.xlu0 %v1987_v23  ;;  %v242_v23 = vld [vmem:[%s6669_s7] sm:$0xff] }
 0x52b   :  { %1994 = vadd.xlane.f32.xlu1 %v1993_v24  ;;  %v243_v24 = vld [vmem:[%s6669_s7 + $0x8] sm:$0xff] }
 0x5b3   :  { %v1986_v26 = vpop.xlane.xlu0 %1985 }
 0x5b4   :  { %v1992_v27 = vpop.xlane.xlu1 %1991 }
 0x5b5   :  { %v1996_v28 = vadd.f32 %v1992_v27, %v1986_v26  ;;  %v5407_v26 = vpack.c.bf16 %v243_v24, %v242_v23 }
 0x5b7   :  { %5529 = vrcp.f32 %v1996_v28  ;;  %v1989_v30 = vpop.xlane.xlu0 %1988 }
 0x5b8   :  { %v1995_v33 = vpop.xlane.xlu1 %1994 }
 0x5b9   :  { %v1997_v34 = vadd.f32 %v1995_v33, %v1989_v30 }
 0x5bb   :  { %5531 = vrcp.f32 %v1997_v34 }
 0x5c1   :  { %v5530_v51 = vpop.eup %5529 }
 0x5c2   :  { %v2004_v52 = vmul.f32 %v5530_v51, %v5524_v17  ;;  %v2002_v57 = vmul.f32 %v5530_v51, %v5522_v16  ;;  %v97_v16 = vld [vmem:[%s6666_s4 + $0x178] sm:$0xff] }
 0x5c3   :  { %v5439_v17 = vpack.c.bf16 %v97_v16, %v96_v15 }
 0x5c4   :  { %4888 = vmatmul.mubr.msk.f32.vlgmr.msra.gmra.mrb[28].mxu1 %vm1240_vm5, %v2004_v52  ;;  %v103_v52 = vld [vmem:[%s6666_s4 + $0x1a8] sm:$0xff] }
 0x5c5   :  { %v5532_v53 = vpop.eup %5531  ;;  %4891 = vmatpush3.msra.mxu1 %v6175_v49  ;;  %4892 = vmatprep.mubr.msk.f32.mxu1 %vm5592_vm1, %v5591_v32 }
 0x5c6   :  { %4895 = vmatprep.subr.mxu1 %v5591_v32  ;;  %v2005_v54 = vmul.f32 %v5532_v53, %v5528_v22  ;;  %v2003_v61 = vmul.f32 %v5532_v53, %v5526_v21  ;;  %v245_v21 = vld [vmem:[%s6669_s7 + $0x18] sm:$0xff] }
 0x5c7   :  { %v5403_v22 = vpack.c.bf16 %v245_v21, %v244_v20 }
 0x5c8   :  { %4893 = vmatmul.mubr.msk.f32.vlgmr.msra.gmra.mrb[30].mxu1 %vm1240_vm5, %v2005_v54  ;;  %v104_v54 = vld [vmem:[%s6666_s4 + $0x1b0] sm:$0xff] }
 0x5c9   :  { %4896 = vmatpush3.msra.mxu1 %v6161_v42  ;;  %4897 = vmatprep.mubr.msk.f32.mxu1 %vm5592_vm1, %v5591_v32  ;;  %v5455_v56 = vpack.c.bf16 %v105_v55, %v104_v54 }
 0x5ca   :  { %4900 = vmatprep.subr.mxu1 %v5591_v32  ;;  %5404 = vmatprep.subr.bf16.mxu0 %v5403_v22 }
 0x5cb   :  { %5406 = vmatpush3.bf16.msra.mxu0 %v5403_v22 }
 0x5cc   :  { %4898 = vmatmul.mubr.msk.f32.vlgmr.msra.gmra.mrb[28].mxu1 %vm1240_vm5, %v2002_v57  ;;  %5408 = vmatprep.subr.bf16.mxu0 %v5407_v26  ;;  %v106_v57 = vld [vmem:[%s6666_s4 + $0x1c0] sm:$0xff] }
 0x5cd   :  { %4901 = vmatpush3.msra.mxu1 %v6159_v41  ;;  %4902 = vmatprep.mubr.msk.f32.mxu1 %vm5592_vm1, %v5591_v32 }
 0x5ce   :  { %5412 = vmatprep.subr.bf16.mxu1 %v5411_v58 }
 0x5d0   :  { %4903 = vmatmul.mubr.msk.f32.vlgmr.msra.gmra.mrb[30].mxu1 %vm1240_vm5, %v2003_v61  ;;  %v109_v61 = vld [vmem:[%s6666_s4 + $0x1d8] sm:$0xff] }
 0x5d1   :  { %5414 = vmatpush3.bf16.msra.mxu1 %v5411_v58  ;;  %4951 = vmatprep.mubr.f32.mxu1 %v6374_v63  ;;  %v107_v58 = vld [vmem:[%s6666_s4 + $0x1c8] sm:$0xff] }
 0x5d2   :  { %5416 = vmatprep.subr.bf16.mxu1 %v5415_v62  ;;  %v5459_v59 = vpack.c.bf16 %v107_v58, %v106_v57 }
 0x5d5   :  { %5418 = vmatpush3.bf16.msra.mxu1 %v5415_v62  ;;  %v5463_v62 = vpack.c.bf16 %v109_v61, %v108_v60 }
 0x5d6   :  { %5420 = vmatprep.subr.bf16.mxu1 %v5419_v2 }
 0x5d9   :  { %5422 = vmatpush3.bf16.msra.mxu1 %v5419_v2  ;;  %v5467_v2 = vpack.c.bf16 %v111_v1, %v110_v0 }
 0x5da   :  { %5424 = vmatprep.subr.bf16.mxu1 %v5423_v5 }
 0x5dd   :  { %5426 = vmatpush3.bf16.msra.mxu1 %v5423_v5  ;;  %v5471_v5 = vpack.c.bf16 %v113_v4, %v112_v3 }
 0x5de   :  { %5428 = vmatprep.subr.bf16.mxu1 %v5427_v8 }
 0x5e1   :  { %5430 = vmatpush3.bf16.msra.mxu1 %v5427_v8 }
 0x5e2   :  { %5432 = vmatprep.subr.bf16.mxu1 %v5431_v11 }
 0x5e5   :  { %5434 = vmatpush3.bf16.msra.mxu1 %v5431_v11 }
 0x5e6   :  { %5436 = vmatprep.subr.bf16.mxu1 %v5435_v14 }
 0x5e9   :  { %5438 = vmatpush3.bf16.msra.mxu1 %v5435_v14 }
 0x5ea   :  { %5440 = vmatprep.subr.bf16.mxu1 %v5439_v17 }
 0x5ed   :  { %5442 = vmatpush3.bf16.msra.mxu1 %v5439_v17 }
 0x5f0   :  { %4952 = vmatmul.mubr.f32.vlgmr.msra.gmra.mrb[32].mxu1 %v6417_v18 }
 0x5f1   :  { %5026 = vmatprep.mubr.f32.mxu1 %v6374_v63 }
 0x69f   :  { %v2221_v27 = vpop.f32.mrb[28].mxu1 }
 0x6a0   :  { %v4899_v28 = vpop.f32.mrb[29].mxu1  ;;  %4909 = vmatprep.mubr.msk.f32.mxu0 %vm931_vm0, %v2221_v27 }
 0x6a3   :  { %v2294_v30 = vpop.f32.mrb[30].mxu1 }
 0x6a4   :  { %v4904_v33 = vpop.f32.mrb[31].mxu1  ;;  %4910 = vmatmul.mubr.msk.f32.vlgmr.msra.gmra.mrb[12].mxu0 %vm931_vm0, %v2294_v30 }
 0x6a5   :  { %5410 = vmatpush3.bf16.msra.mxu0 %v5407_v26  ;;  %4916 = vmatprep.mubr.msk.f32.mxu0 %vm931_vm0, %v6325_v29 }
 0x6a6   :  { %4954 = vmatprep.subr.mxu0 %v5591_v32 }
 0x6ac   :  { %4917 = vmatmul.mubr.msk.f32.vlgmr.msra.gmra.mrb[12].mxu0 %vm931_vm0, %v6327_v31  ;;  %v102_v31 = vld [vmem:[%s6666_s4 + $0x1a0] sm:$0xff] }
 0x6ad   :  { %4956 = vmatprep.mubr.msk.f32.mxu0 %vm5592_vm1, %v5591_v32  ;;  %v5451_v53 = vpack.c.bf16 %v103_v52, %v102_v31 }
 0x6ae   :  { %4955 = vmatpush3.xpose.msk.msra.mxu0 %vm931_vm0, %v6144_v36  ;;  %v99_v36 = vld [vmem:[%s6666_s4 + $0x188] sm:$0xff] }
 0x6af   :  { %4959 = vmatprep.subr.mxu0 %v5591_v32 }
 0x6c3   :  { %v4953_v34 = vpop.f32.mrb[32].mxu1 }
 0x6c4   :  { %v2569_v51 = vpop.f32.mrb[33].mxu1 }
 0x6c5   :  { %4957 = vmatmul.mubr.msk.f32.vlgmr.msra.gmra.mrb[14].mxu0 %vm931_vm0, %v2569_v51 }
 0x6c6   :  { %4960 = vmatpush3.xpose.msk.msra.mxu0 %vm931_vm0, %v6142_v35  ;;  %4961 = vmatprep.mubr.msk.f32.mxu0 %vm5592_vm1, %v5591_v32  ;;  %v98_v35 = vld [vmem:[%s6666_s4 + $0x180] sm:$0xff] }
 0x6c7   :  { %4964 = vmatprep.subr.mxu0 %v5591_v32 }
 0x6c9   :  { %4962 = vmatmul.mubr.msk.f32.vlgmr.msra.gmra.mrb[16].mxu0 %vm931_vm0, %v4953_v34 }
 0x6ca   :  { %4965 = vmatpush3.xpose.msk.msra.mxu0 %vm931_vm0, %v6165_v44  ;;  %4966 = vmatprep.mubr.msk.f32.mxu0 %vm5592_vm1, %v5591_v32  ;;  %v5443_v44 = vpack.c.bf16 %v99_v36, %v98_v35 }
 0x6cb   :  { %4969 = vmatprep.subr.mxu0 %v5591_v32 }
 0x6cc   :  { %5444 = vmatprep.subr.bf16.mxu1 %v5443_v44 }
 0x6cd   :  { %4967 = vmatmul.mubr.msk.f32.vlgmr.msra.gmra.mrb[18].mxu0 %vm931_vm0, %v2569_v51  ;;  %5446 = vmatpush3.bf16.msra.mxu1 %v5443_v44 }
 0x6ce   :  { %4970 = vmatpush3.xpose.msk.msra.mxu0 %vm931_vm0, %v6163_v43  ;;  %4971 = vmatprep.mubr.msk.f32.mxu0 %vm5592_vm1, %v5591_v32  ;;  %v100_v43 = vld [vmem:[%s6666_s4 + $0x190] sm:$0xff] }
 0x6cf   :  { %4974 = vmatprep.subr.mxu0 %v5591_v32 }
 0x6d1   :  { %4972 = vmatmul.mubr.msk.f32.vlgmr.msra.gmra.mrb[20].mxu0 %vm931_vm0, %v4953_v34 }
 0x6d2   :  { %4975 = vmatpush3.msra.mxu0 %v6173_v48  ;;  %4976 = vmatprep.mubr.msk.f32.mxu0 %vm5592_vm1, %v5591_v32  ;;  %v101_v48 = vld [vmem:[%s6666_s4 + $0x198] sm:$0xff] }
 0x6d3   :  { %4979 = vmatprep.subr.mxu0 %v5591_v32  ;;  %v5447_v29 = vpack.c.bf16 %v101_v48, %v100_v43 }
 0x6d5   :  { %5448 = vmatprep.subr.bf16.mxu1 %v5447_v29 }
 0x6d6   :  { %5450 = vmatpush3.bf16.msra.mxu1 %v5447_v29 }
 0x6d7   :  { %5452 = vmatprep.subr.bf16.mxu1 %v5451_v53 }
 0x6da   :  { %5454 = vmatpush3.bf16.msra.mxu1 %v5451_v53 }
 0x6db   :  { %5456 = vmatprep.subr.bf16.mxu1 %v5455_v56 }
 0x6de   :  { %5458 = vmatpush3.bf16.msra.mxu1 %v5455_v56 }
 0x6df   :  { %5460 = vmatprep.subr.bf16.mxu1 %v5459_v59 }
 0x6e2   :  { %5462 = vmatpush3.bf16.msra.mxu1 %v5459_v59 }
 0x6e3   :  { %5464 = vmatprep.subr.bf16.mxu1 %v5463_v62 }
 0x6e6   :  { %5466 = vmatpush3.bf16.msra.mxu1 %v5463_v62 }
 0x6e7   :  { %5468 = vmatprep.subr.bf16.mxu1 %v5467_v2 }
 0x6ea   :  { %5470 = vmatpush3.bf16.msra.mxu1 %v5467_v2 }
 0x6eb   :  { %5472 = vmatprep.subr.bf16.mxu1 %v5471_v5 }
 0x6ee   :  { %5474 = vmatpush3.bf16.msra.mxu1 %v5471_v5 }
 0x6f1   :  { %5027 = vmatmul.mubr.f32.vlgmr.msra.gmra.mrb[34].mxu1 %v6417_v18 }
 0x77f   :  { %v6517_v6 = vpop.f32.mrb[12].mxu0 }
 0x780   :  { %v6519_v7 = vpop.f32.mrb[13].mxu0 }
 0x798   :  { %v2647_v8 = vpop.f32.mrb[14].mxu0 }
 0x799   :  { %v2724_v9 = vsel %vm6257_vm4, %v2647_v8, -1e+09  ;;  %v4958_v10 = vpop.f32.mrb[15].mxu0 }
 0x79a   :  { %v2868_v11 = vsel %vm1240_vm5, %v2724_v9, -inf }
 0x79b   :  { %2869 = vmax.xlane.f32.xlu0 %v2868_v11 }
 0x79c   :  { %v2720_v12 = vpop.f32.mrb[16].mxu0 }
 0x79d   :  { %v2725_v13 = vsel %vm6264_vm6, %v2720_v12, -1e+09  ;;  %v4963_v14 = vpop.f32.mrb[17].mxu0 }
 0x79e   :  { %v2871_v15 = vsel %vm1240_vm5, %v2725_v13, -inf }
 0x79f   :  { %2872 = vmax.xlane.f32.xlu0 %v2871_v15 }
 0x7a0   :  { %v2792_v16 = vpop.f32.mrb[18].mxu0 }
 0x7a1   :  { %v2866_v17 = vsel %vm6257_vm4, %v2792_v16, -1e+09  ;;  %v4968_v20 = vpop.f32.mrb[19].mxu0 }
 0x7a2   :  { %v2874_v21 = vsel %vm1240_vm5, %v2866_v17, -inf }
 0x7a3   :  { %2875 = vmax.xlane.f32.xlu1 %v2874_v21 }
 0x7a4   :  { %v2862_v22 = vpop.f32.mrb[20].mxu0 }
 0x7a5   :  { %v2867_v23 = vsel %vm6264_vm6, %v2862_v22, -1e+09  ;;  %v4973_v24 = vpop.f32.mrb[21].mxu0 }
 0x7a6   :  { %v2877_v26 = vsel %vm1240_vm5, %v2867_v23, -inf }
 0x7a7   :  { %2878 = vmax.xlane.f32.xlu1 %v2877_v26 }
 0x7c4   :  { %v5028_v61 = vpop.f32.mrb[34].mxu1 }
 0x7c5   :  { %v3274_v62 = vpop.f32.mrb[35].mxu1 }
 0x828   :  { %v2870_v27 = vpop.xlane.xlu0 %2869 }
 0x82c   :  { %v2873_v51 = vpop.xlane.xlu0 %2872 }
 0x830   :  { %v2876_v28 = vpop.xlane.xlu1 %2875 }
 0x831   :  { %v2880_v30 = vmax.f32 %v2870_v27, %v2876_v28 }
 0x833   :  { %v2882_v33 = vsub.f32 %v2724_v9, %v2880_v30  ;;  %v2888_v34 = vsub.f32 %v2866_v17, %v2880_v30 }
 0x834   :  { %v2879_v35 = vpop.xlane.xlu1 %2878 }
 0x835   :  { %v2884_v36 = vmul.f32 1.442695, %v2882_v33  ;;  %v2890_v43 = vmul.f32 1.442695, %v2888_v34  ;;  %v2881_v44 = vmax.f32 %v2873_v51, %v2879_v35 }
 0x837   :  { %5533 = vpow2.f32 %v2884_v36  ;;  %v2883_v48 = vsub.f32 %v2725_v13, %v2881_v44  ;;  %v2889_v29 = vsub.f32 %v2867_v23, %v2881_v44 }
 0x838   :  { %5535 = vpow2.f32 %v2890_v43 }
 0x839   :  { %v2886_v31 = vmul.f32 1.442695, %v2883_v48  ;;  %v2892_v52 = vmul.f32 1.442695, %v2889_v29 }
 0x83b   :  { %5537 = vpow2.f32 %v2886_v31 }
 0x83c   :  { %5539 = vpow2.f32 %v2892_v52 }
 0x841   :  { %v5534_v53 = vpop.eup %5533 }
 0x842   :  { %v5536_v54 = vpop.eup %5535  ;;  %v2894_v55 = vsel %vm1240_vm5, %v5534_v53, 0.0 }
 0x843   :  { %2895 = vadd.xlane.f32.xlu0 %v2894_v55  ;;  %v2900_v56 = vsel %vm1240_vm5, %v5536_v54, 0.0 }
 0x844   :  { %2901 = vadd.xlane.f32.xlu1 %v2900_v56 }
 0x845   :  { %v5538_v57 = vpop.eup %5537 }
 0x846   :  { %v5540_v58 = vpop.eup %5539  ;;  %v2897_v59 = vsel %vm1240_vm5, %v5538_v57, 0.0 }
 0x847   :  { %v2903_v60 = vsel %vm1240_vm5, %v5540_v58, 0.0  ;;  %2898 = vadd.xlane.f32.xlu0 %v2897_v59 }
 0x848   :  { %2904 = vadd.xlane.f32.xlu1 %v2903_v60 }
 0x8d0   :  { %v2896_v0 = vpop.xlane.xlu0 %2895 }
 0x8d1   :  { %v2902_v1 = vpop.xlane.xlu1 %2901 }
 0x8d2   :  { %v2906_v2 = vadd.f32 %v2902_v1, %v2896_v0  ;;  %v5566_v0 = vld [vmem:[%s6662_s0 + $0x10] sm:$0xff] }
 0x8d3   :  { %v2461_v1 = vadd.f32 %v5566_v0, %v6517_v6 }
 0x8d4   :  { %5541 = vrcp.f32 %v2906_v2  ;;  %v2899_v3 = vpop.xlane.xlu0 %2898 }
 0x8d5   :  { %v2905_v4 = vpop.xlane.xlu1 %2904 }
 0x8d6   :  { %v2907_v5 = vadd.f32 %v2905_v4, %v2899_v3 }
 0x8d8   :  { %5543 = vrcp.f32 %v2907_v5 }
 0x8de   :  { %v5542_v8 = vpop.eup %5541 }
 0x8df   :  { %v2914_v9 = vmul.f32 %v5542_v8, %v5536_v54  ;;  %v2912_v12 = vmul.f32 %v5542_v8, %v5534_v53 }
 0x8e1   :  { %4977 = vmatmul.mubr.msk.f32.vlgmr.msra.gmra.mrb[22].mxu0 %vm1240_vm5, %v2914_v9 }
 0x8e2   :  { %v5544_v10 = vpop.eup %5543  ;;  %4980 = vmatpush3.msra.mxu0 %v6171_v47  ;;  %4981 = vmatprep.mubr.msk.f32.mxu0 %vm5592_vm1, %v5591_v32 }
 0x8e3   :  { %4984 = vmatprep.subr.mxu0 %v5591_v32  ;;  %v2915_v11 = vmul.f32 %v5544_v10, %v5540_v58  ;;  %v2913_v47 = vmul.f32 %v5544_v10, %v5538_v57 }
 0x8e5   :  { %4982 = vmatmul.mubr.msk.f32.vlgmr.msra.gmra.mrb[24].mxu0 %vm1240_vm5, %v2915_v11 }
 0x8e6   :  { %4985 = vmatpush3.msra.mxu0 %v6157_v40  ;;  %4986 = vmatprep.mubr.msk.f32.mxu0 %vm5592_vm1, %v5591_v32 }
 0x8e7   :  { %4989 = vmatprep.subr.mxu0 %v5591_v32 }
 0x8e9   :  { %4987 = vmatmul.mubr.msk.f32.vlgmr.msra.gmra.mrb[22].mxu0 %vm1240_vm5, %v2912_v12 }
 0x8ea   :  { %4990 = vmatpush3.msra.mxu0 %v6155_v39  ;;  %4991 = vmatprep.mubr.msk.f32.mxu0 %vm5592_vm1, %v5591_v32 }
 0x8eb   :  { %5029 = vmatprep.subr.mxu0 %v5591_v32 }
 0x8ed   :  { %4992 = vmatmul.mubr.msk.f32.vlgmr.msra.gmra.mrb[24].mxu0 %vm1240_vm5, %v2913_v47  ;;  %v249_v47 = vld [vmem:[%s6669_s7 + $0x38] sm:$0xff] }
 0x8ee   :  { %5031 = vmatprep.mubr.msk.f32.mxu0 %vm5592_vm1, %v5591_v32 }
 0x8f1   :  { %5030 = vmatpush3.xpose.msk.msra.mxu0 %vm931_vm0, %v6153_v38 }
 0x8f2   :  { %5034 = vmatprep.subr.mxu0 %v5591_v32 }
 0x8f4   :  { %5032 = vmatmul.mubr.msk.f32.vlgmr.msra.gmra.mrb[26].mxu0 %vm931_vm0, %v3274_v62 }
 0x8f5   :  { %5035 = vmatpush3.xpose.msk.msra.mxu0 %vm931_vm0, %v6151_v37  ;;  %5036 = vmatprep.mubr.msk.f32.mxu0 %vm5592_vm1, %v5591_v32 }
 0x8f6   :  { %5039 = vmatprep.subr.mxu0 %v5591_v32 }
 0x8f8   :  { %5037 = vmatmul.mubr.msk.f32.vlgmr.msra.gmra.mrb[28].mxu0 %vm931_vm0, %v5028_v61 }
 0x8f9   :  { %5040 = vmatpush3.xpose.msk.msra.mxu0 %vm931_vm0, %v6169_v46  ;;  %5041 = vmatprep.mubr.msk.f32.mxu0 %vm5592_vm1, %v5591_v32 }
 0x8fa   :  { %5044 = vmatprep.subr.mxu0 %v5591_v32 }
 0x8fc   :  { %5042 = vmatmul.mubr.msk.f32.vlgmr.msra.gmra.mrb[30].mxu0 %vm931_vm0, %v3274_v62 }
 0x8fd   :  { %5045 = vmatpush3.xpose.msk.msra.mxu0 %vm931_vm0, %v6167_v45  ;;  %5046 = vmatprep.mubr.msk.f32.mxu0 %vm5592_vm1, %v5591_v32 }
 0x8fe   :  { %5049 = vmatprep.subr.mxu0 %v5591_v32 }
 0x900   :  { %5047 = vmatmul.mubr.msk.f32.vlgmr.msra.gmra.mrb[32].mxu0 %vm931_vm0, %v5028_v61  ;;  %v5565_v61 = vld [vmem:[%s6662_s0] sm:$0xff] }
 0x901   :  { %5050 = vmatpush3.msra.mxu0 %v6177_v50  ;;  %5051 = vmatprep.mubr.msk.f32.mxu0 %vm5592_vm1, %v5591_v32  ;;  %v2460_v62 = vadd.f32 %v5565_v61, %v6519_v7 }
 0x902   :  { %5054 = vmatprep.subr.mxu0 %v5591_v32 }
 0x9bc   :  { %v6581_v37 = vpop.f32.mrb[22].mxu0 }
 0x9bd   :  { %v4988_v38 = vpop.f32.mrb[23].mxu0 }
 0x9c0   :  { %v6583_v39 = vpop.f32.mrb[24].mxu0 }
 0x9c1   :  { %v4993_v40 = vpop.f32.mrb[25].mxu0 }
 0x9c7   :  { %v3352_v45 = vpop.f32.mrb[26].mxu0 }
 0x9c8   :  { %v3429_v46 = vsel %vm6257_vm4, %v3352_v45, -1e+09  ;;  %v5033_v13 = vpop.f32.mrb[27].mxu0 }
 0x9c9   :  { %v3573_v14 = vsel %vm1240_vm5, %v3429_v46, -inf }
 0x9ca   :  { %3574 = vmax.xlane.f32.xlu0 %v3573_v14 }
 0x9cb   :  { %v3425_v50 = vpop.f32.mrb[28].mxu0 }
 0x9cc   :  { %v3430_v15 = vsel %vm6264_vm6, %v3425_v50, -1e+09  ;;  %v5038_v16 = vpop.f32.mrb[29].mxu0 }
 0x9cd   :  { %v3576_v17 = vsel %vm1240_vm5, %v3430_v15, -inf }
 0x9ce   :  { %3577 = vmax.xlane.f32.xlu0 %v3576_v17 }
 0x9cf   :  { %v3497_v20 = vpop.f32.mrb[30].mxu0 }
 0x9d0   :  { %v3571_v21 = vsel %vm6257_vm4, %v3497_v20, -1e+09  ;;  %v5043_v22 = vpop.f32.mrb[31].mxu0 }
 0x9d1   :  { %v3579_v23 = vsel %vm1240_vm5, %v3571_v21, -inf }
 0x9d2   :  { %3580 = vmax.xlane.f32.xlu1 %v3579_v23 }
 0x9d3   :  { %v3567_v24 = vpop.f32.mrb[32].mxu0 }
 0x9d4   :  { %v3572_v26 = vsel %vm6264_vm6, %v3567_v24, -1e+09  ;;  %v5048_v27 = vpop.f32.mrb[33].mxu0 }
 0x9d5   :  { %v3582_v28 = vsel %vm1240_vm5, %v3572_v26, -inf }
 0x9d6   :  { %3583 = vmax.xlane.f32.xlu1 %v3582_v28 }
 0xa57   :  { %v3575_v30 = vpop.xlane.xlu0 %3574 }
 0xa5b   :  { %v3578_v36 = vpop.xlane.xlu0 %3577 }
 0xa5f   :  { %v3581_v33 = vpop.xlane.xlu1 %3580 }
 0xa60   :  { %v3585_v34 = vmax.f32 %v3575_v30, %v3581_v33 }
 0xa62   :  { %v3587_v51 = vsub.f32 %v3429_v46, %v3585_v34  ;;  %v3593_v35 = vsub.f32 %v3571_v21, %v3585_v34 }
 0xa63   :  { %v3584_v19 = vpop.xlane.xlu1 %3583 }
 0xa64   :  { %v3589_v43 = vmul.f32 1.442695, %v3587_v51  ;;  %v3595_v44 = vmul.f32 1.442695, %v3593_v35  ;;  %v3586_v48 = vmax.f32 %v3578_v36, %v3584_v19 }
 0xa66   :  { %5545 = vpow2.f32 %v3589_v43  ;;  %v3588_v29 = vsub.f32 %v3430_v15, %v3586_v48  ;;  %v3594_v31 = vsub.f32 %v3572_v26, %v3586_v48 }
 0xa67   :  { %5547 = vpow2.f32 %v3595_v44 }
 0xa68   :  { %v3591_v25 = vmul.f32 1.442695, %v3588_v29  ;;  %v3597_v52 = vmul.f32 1.442695, %v3594_v31  ;;  %v4149_v31 = vld [vmem:[%s6670_s8] ss:$0 sm:$0xff] }
 0xa69   :  { %s5594_s8 = smov [#allocation2]  }
 0xa6a   :  { %5549 = vpow2.f32 %v3591_v25 }
 0xa6b   :  { %5551 = vpow2.f32 %v3597_v52 }
 0xa70   :  { %v5546_v53 = vpop.eup %5545 }
 0xa71   :  { %v5548_v54 = vpop.eup %5547  ;;  %v3599_v55 = vsel %vm1240_vm5, %v5546_v53, 0.0 }
 0xa72   :  { %3600 = vadd.xlane.f32.xlu0 %v3599_v55  ;;  %v3605_v56 = vsel %vm1240_vm5, %v5548_v54, 0.0 }
 0xa73   :  { %3606 = vadd.xlane.f32.xlu1 %v3605_v56 }
 0xa74   :  { %v5550_v57 = vpop.eup %5549 }
 0xa75   :  { %v5552_v58 = vpop.eup %5551  ;;  %v3602_v59 = vsel %vm1240_vm5, %v5550_v57, 0.0 }
 0xa76   :  { %v3608_v60 = vsel %vm1240_vm5, %v5552_v58, 0.0  ;;  %3603 = vadd.xlane.f32.xlu0 %v3602_v59 }
 0xa77   :  { %3609 = vadd.xlane.f32.xlu1 %v3608_v60 }
 0xa7a   :  { %2462 = vadd.xlane.f32.xlu0 %v2460_v62 }
 0xa7b   :  { %2464 = vadd.xlane.f32.xlu1 %v2461_v1 }
 0xaff   :  { %v3601_v2 = vpop.xlane.xlu0 %3600 }
 0xb00   :  { %v3607_v3 = vpop.xlane.xlu1 %3606 }
 0xb01   :  { %v3611_v4 = vadd.f32 %v3607_v3, %v3601_v2 }
 0xb03   :  { %5553 = vrcp.f32 %v3611_v4  ;;  %v3604_v5 = vpop.xlane.xlu0 %3603 }
 0xb04   :  { %v3610_v8 = vpop.xlane.xlu1 %3609 }
 0xb05   :  { %v3612_v9 = vadd.f32 %v3610_v8, %v3604_v5 }
 0xb07   :  { %5555 = vrcp.f32 %v3612_v9  ;;  %v2463_v15 = vpop.xlane.xlu0 %2462 }
 0xb08   :  { %v2465_v50 = vpop.xlane.xlu1 %2464  ;;  %v2467_v17 = vmul.f32 0.0078125, %v2463_v15 }
 0xb09   :  { %v2468_v16 = vmul.f32 0.0078125, %v2465_v50 }
 0xb0a   :  { %v2469_v24 = vsub.f32 %v2460_v62, %v2467_v17 }
 0xb0b   :  { %v2470_v21 = vsub.f32 %v2461_v1, %v2468_v16 }
 0xb0c   :  { %v2471_v28 = vmul.f32 %v2469_v24, %v2469_v24 }
 0xb0d   :  { %v5554_v10 = vpop.eup %5553  ;;  %v2472_v27 = vmul.f32 %v2470_v21, %v2470_v21 }
 0xb0e   :  { %v3619_v11 = vmul.f32 %v5554_v10, %v5548_v54  ;;  %v3617_v12 = vmul.f32 %v5554_v10, %v5546_v53  ;;  %v4150_v54 = vld [vmem:[%s6671_s9] ss:$0 sm:$0xff]  ;;  %s4110_s9 = sshll.u32 %s5594_s8, 4  ;;  %s4111_s9 = int_to_ptr.vmem [resolvable:$true] %s4110_s9 }
 0xb0f   :  { %s5567_s30 = scalar_lea.vmem %s4111_s9, 512  ;;  %p5572_p1 = scmp.lt.s32.totalorder %s4111_s9, %s4111_s9 }
 0xb10   :  { %5052 = vmatmul.mubr.msk.f32.vlgmr.msra.gmra.mrb[34].mxu0 %vm1240_vm5, %v3619_v11  ;;  %p5568_p0 = scmp.ne.s32.totalorder %s4111_s9, %s5567_s30  ;;  %p5573_p2 = scmp.lt.s32.totalorder %s5567_s30, %s5567_s30 }
 0xb11   :  { %v5556_v7 = vpop.eup %5555  ;;  %5055 = vmatpush3.msra.mxu0 %v6175_v49  ;;  %5056 = vmatprep.mubr.msk.f32.mxu0 %vm5592_vm1, %v5591_v32 }
 0xb12   :  { %5059 = vmatprep.subr.mxu0 %v5591_v32  ;;  %v3620_v6 = vmul.f32 %v5556_v7, %v5552_v58  ;;  %v3618_v49 = vmul.f32 %v5556_v7, %v5550_v57  ;;  %p5574_p3 = por %p5573_p2, %p5572_p1 }
 0xb14   :  { %5057 = vmatmul.mubr.msk.f32.vlgmr.msra.gmra.mrb[36].mxu0 %vm1240_vm5, %v3620_v6  ;;  %p5575_p4 = pnand %p5574_p3, %p5568_p0 }
 0xb15   :  { %5060 = vmatpush3.msra.mxu0 %v6161_v42  ;;  %5061 = vmatprep.mubr.msk.f32.mxu0 %vm5592_vm1, %v5591_v32  ;;  %v248_v42 = vld [vmem:[%s6669_s7 + $0x30] sm:$0xff] }
 0xb16   :  { %5064 = vmatprep.subr.mxu0 %v5591_v32  ;;  %v5475_v38 = vpack.c.bf16 %v249_v47, %v248_v42 }
 0xb18   :  { %5062 = vmatmul.mubr.msk.f32.vlgmr.msra.gmra.mrb[34].mxu0 %vm1240_vm5, %v3617_v12  ;;  %5476 = vmatprep.subr.bf16.mxu1 %v5475_v38 }
 0xb19   :  { %5065 = vmatpush3.msra.mxu0 %v6159_v41  ;;  %5066 = vmatprep.mubr.msk.f32.mxu0 %vm5592_vm1, %v5591_v32  ;;  %v246_v41 = vld [vmem:[%s6669_s7 + $0x20] sm:$0xff]  ;;  %v247_v32 = vld [vmem:[%s6669_s7 + $0x28] sm:$0xff] }
 0xb1a   :  { %5478 = vmatpush3.bf16.msra.mxu1 %v5475_v38  ;;  %v5479_v40 = vpack.c.bf16 %v247_v32, %v246_v41 }
 0xb1c   :  { %5067 = vmatmul.mubr.msk.f32.vlgmr.msra.gmra.mrb[36].mxu0 %vm1240_vm5, %v3618_v49  ;;  %5480 = vmatprep.subr.bf16.mxu1 %v5479_v40 }
 0xbeb   :  { %v3836_v45 = vpop.f32.mrb[34].mxu0 }
 0xbec   :  { %v5063_v46 = vpop.f32.mrb[35].mxu0  ;;  %5073 = vmatprep.mubr.msk.f32.mxu1 %vm931_vm0, %v3836_v45 }
 0xbef   :  { %v3909_v13 = vpop.f32.mrb[36].mxu0 }
 0xbf0   :  { %v5068_v14 = vpop.f32.mrb[37].mxu0  ;;  %5074 = vmatmul.mubr.msk.f32.vlgmr.msra.gmra.mrb[36].mxu1 %vm931_vm0, %v3909_v13 }
 0xbf1   :  { %5482 = vmatpush3.bf16.msra.mxu1 %v5479_v40  ;;  %5080 = vmatprep.mubr.msk.f32.mxu1 %vm931_vm0, %v6581_v37 }
 0xbf8   :  { %5081 = vmatmul.mubr.msk.f32.vlgmr.msra.gmra.mrb[36].mxu1 %vm931_vm0, %v6583_v39 }
 0xccb   :  { %v5082_v20 = vpop.f32.mrb[36].mxu1 }
 0xccc   :  { %v4076_v22 = vadd.f32 %v5082_v20, %v6417_v18  ;;  %v4066_v23 = vpop.f32.mrb[37].mxu1 }
 0xccd   :  { %v4075_v26 = vadd.f32 %v4066_v23, %v6374_v63 }
 0xcce   :  { %4079 = vadd.xlane.f32.xlu1 %v4076_v22 }
 0xccf   :  { %4077 = vadd.xlane.f32.xlu0 %v4075_v26 }
 0xcd2   :  { %2475 = vadd.xlane.f32.xlu1 %v2472_v27 }
 0xcd3   :  { %2473 = vadd.xlane.f32.xlu0 %v2471_v28 }
 0xd5b   :  { %v4080_v37 = vpop.xlane.xlu1 %4079 }
 0xd5c   :  { %v4082_v39 = vmul.f32 0.0078125, %v4080_v37  ;;  %v4078_v30 = vpop.xlane.xlu0 %4077 }
 0xd5d   :  { %v4081_v33 = vmul.f32 0.0078125, %v4078_v30 }
 0xd5e   :  { %v4084_v34 = vsub.f32 %v4076_v22, %v4082_v39 }
 0xd5f   :  { %v4083_v51 = vsub.f32 %v4075_v26, %v4081_v33  ;;  %v2476_v35 = vpop.xlane.xlu1 %2475 }
 0xd60   :  { %v2478_v36 = vmul.f32 0.0078125, %v2476_v35  ;;  %v2474_v19 = vpop.xlane.xlu0 %2473  ;;  %v4086_v18 = vmul.f32 %v4084_v34, %v4084_v34 }
 0xd61   :  { %v2477_v43 = vmul.f32 0.0078125, %v2474_v19  ;;  %v4085_v44 = vmul.f32 %v4083_v51, %v4083_v51 }
 0xd62   :  { %v2480_v48 = vadd.f32 1e-06, %v2478_v36  ;;  %4089 = vadd.xlane.f32.xlu1 %v4086_v18 }
 0xd63   :  { %v2479_v63 = vadd.f32 1e-06, %v2477_v43  ;;  %4087 = vadd.xlane.f32.xlu0 %v4085_v44 }
 0xd64   :  { %5557 = vrsqrt.f32 %v2480_v48 }
 0xd65   :  { %5559 = vrsqrt.f32 %v2479_v63 }
 0xd6e   :  { %v5558_v29 = vpop.eup %5557 }
 0xd6f   :  { %v5560_v25 = vpop.eup %5559  ;;  %v2484_v52 = vmul.f32 %v5558_v29, %v2470_v21 }
 0xd70   :  { %v2483_v53 = vmul.f32 %v5560_v25, %v2469_v24 }
 0xd71   :  { %v2492_v55 = vmul.f32 %v4149_v31, %v2484_v52 }
 0xd72   :  { %v2491_v56 = vmul.f32 %v4149_v31, %v2483_v53 }
 0xd73   :  { %v2500_v57 = vadd.f32 %v4150_v54, %v2492_v55 }
 0xd74   :  { %v2499_v58 = vadd.f32 %v4150_v54, %v2491_v56 }
 0xd75   :  { %2502 = vst [vmem:[#allocation2 + $0x10] sm:$0xff] %v2500_v57 }
 0xd76   :  { %2501 = vst [vmem:[#allocation2] sm:$0xff] %v2499_v58 }
 0xdef   :  { %v4090_v59 = vpop.xlane.xlu1 %4089 }
 0xdf0   :  { %v4092_v60 = vmul.f32 0.0078125, %v4090_v59  ;;  %v4088_v61 = vpop.xlane.xlu0 %4087 }
 0xdf1   :  { %v4091_v62 = vmul.f32 0.0078125, %v4088_v61 }
 0xdf2   :  { %v4094_v0 = vadd.f32 1e-06, %v4092_v60 }
 0xdf3   :  { %v4093_v1 = vadd.f32 1e-06, %v4091_v62 }
 0xdf4   :  { %5561 = vrsqrt.f32 %v4094_v0 }
 0xdf5   :  { %5563 = vrsqrt.f32 %v4093_v1 }
 0xdfe   :  { %v5562_v2 = vpop.eup %5561 }
 0xdff   :  { %v5564_v3 = vpop.eup %5563  ;;  %v4098_v4 = vmul.f32 %v5562_v2, %v4084_v34 }
 0xe00   :  { %v4097_v5 = vmul.f32 %v5564_v3, %v4083_v51 }
 0xe01   :  { %v4100_v8 = vmul.f32 %v4149_v31, %v4098_v4 }
 0xe02   :  { %v4099_v9 = vmul.f32 %v4149_v31, %v4097_v5 }
 0xe03   :  { %v4102_v10 = vadd.f32 %v4150_v54, %v4100_v8 }
 0xe04   :  { %v4101_v11 = vadd.f32 %v4150_v54, %v4099_v9 }
 0xe05   :  { %4104 = vst [vmem:[#allocation2 + $0x18] sm:$0xff] %v4102_v10 }
 0xe06   :  { %4103 = vst [vmem:[#allocation2 + $0x8] sm:$0xff] %v4101_v11 }
 0xe07   :  { %5578 = shalt.err (!%p5575_p4)
}
 0xe08   :  { %s5579_s13 = scalar_lea.hbm %s6672_s10, 512 }
 0xe09   :  { %p5580_p5 = scmp.ne.s32.totalorder %s6672_s10, %s5579_s13  ;;  %p5583_p6 = scmp.lt.u32.totalorder %s5579_s13, %s6672_s10 }
 0xe0b   :  { %p5585_p7 = pnand %p5583_p6, %p5580_p5 }
 0xe0d   :  { %5588 = shalt.err (!%p5585_p7)
}
 0xe0e   :  { %s5595_s18 = smov 256   ;;  %s5596_s1 = smov 16  }
 0xe0f   :  { %4116 = dma.vmem_to_hbm [thread:$0]  %s4111_s9, 512, %s6672_s10, [#allocation3], %s5595_s18, %s5595_s18, %s5596_s1  }
 0xe10   :  { %5589 = dma.done.wait [#allocation3], 512  }
 0xe11   :  { %5590 = vsyncadd [#allocation3], 4294966784 }
 0xe12   :  { %4120 = vsyncpa [#allocation3], 1 }

</bundles_post_ra>
